<compile_context>
chip_gen: v7x
topology: tpu7x:2x2x1
jax: 0.10.0
libtpu: 0.0.40
codegen_flags: <defaults>
</compile_context>

<pallas_src>
import functools

import jax
import jax.numpy as jnp
from jax import lax
from jax.experimental import pallas as pl
from jax.experimental.pallas import tpu as pltpu


def ftb_kernel(x_ref, w1b_ref, b1_ref, w1d_ref, b1d_ref, wa_ref, wb_ref, b2_ref,
               out_ref, *, t_dim, n_batch, compute_dtype):
    # x_ref   : (C*F, B*T)    input; rows = (c, f), lanes = (b, t)        [f32]
    # w1b_ref : (C_r*F, C*F)  kron(w1, I_F)      folded Conv2D_1          [cd]
    # b1_ref  : (C_r*F, 1)                                                [f32]
    # w1d_ref : (K, F, C_r*F) per-tap Conv1D_1 weights (folded BN)        [cd]
    # b1d_ref : (F, 1)                                                    [f32]
    # wa_ref  : (C*F, C*F)    kron(w2a, wfc)  == Conv2D_2(A) o Freq_FC    [cd]
    # wb_ref  : (C*F, C*F)    kron(w2b, I_F)  == Conv2D_2(B) skip path    [cd]
    # b2_ref  : (C*F, 1)                                                  [f32]
    # out_ref : (C*F, B*T)                                                [f32]
    cd = compute_dtype
    T = t_dim
    K, F, CrF = w1d_ref.shape
    P = (K - 1) // 2
    CF = x_ref.shape[0]
    C = CF // F

    x = x_ref[...]                                  # f32; mask & skip path
    xc = x.astype(cd)

    # ---- Conv2D_1 (1x1 conv + folded BN) + ReLU: ONE MXU dot over the whole
    #      batch (B*T lanes). -------------------------------------------------
    hidden = jnp.dot(w1b_ref[...], xc, preferred_element_type=jnp.float32)
    hidden = jnp.maximum(hidden + b1_ref[...], 0.0).astype(cd)   # (C_r*F, B*T)

    # ---- Conv1D_1 (k=K, pad=P, folded BN) + ReLU -----------------------------
    # K shifted (F, C_r*F) @ (C_r*F, B*T) dots accumulated in an f32 value.
    # Time shifts are built per batch lane-segment with value-level slices and
    # zero columns: no im2col scratch, no masked scratch stores, no
    # store->load round trip.
    acc = None
    for k in range(K):
        sh = k - P                                  # time shift of this tap
        segs = []
        for b in range(n_batch):
            seg = hidden[:, b * T:(b + 1) * T]
            if sh < 0:                              # zero padding on the left
                seg = jnp.concatenate(
                    [jnp.zeros((CrF, -sh), cd), seg[:, :T + sh]], axis=1)
            elif sh > 0:                            # zero padding on the right
                seg = jnp.concatenate(
                    [seg[:, sh:], jnp.zeros((CrF, sh), cd)], axis=1)
            segs.append(seg)
        shifted = segs[0] if n_batch == 1 else jnp.concatenate(segs, axis=1)
        tap = jnp.dot(w1d_ref[k], shifted, preferred_element_type=jnp.float32)
        acc = tap if acc is None else acc + tap
    out2 = jnp.maximum(acc + b1d_ref[...], 0.0)     # (F, B*T) f32

    # ---- mask * x, then (Freq_FC folded into Conv2D_2 half A) + skip + ReLU --
    # out2 is broadcast over channels along sublanes (row c*F+f <- out2[f]);
    # Freq_FC and the first Conv2D_2 half collapse into ONE host-prefolded
    # (C*F, C*F) dot; the skip half is kron(w2b, I_F) @ x.  Output is produced
    # and stored in the same (C*F, B*T) layout (no in-kernel relayout).
    mask = jnp.concatenate([out2] * C, axis=0)      # (C*F, B*T) f32
    out3 = (mask * x).astype(cd)
    y = (jnp.dot(wa_ref[...], out3, preferred_element_type=jnp.float32)
         + jnp.dot(wb_ref[...], xc, preferred_element_type=jnp.float32)
         + b2_ref[...])
    out_ref[...] = jnp.maximum(y, 0.0)


def real_ftb_pallas(x, params, *, compute_dtype=jnp.float32):
    """x: (B, C, F, T) f32.  params: BN-folded weights (see init_params).

    compute_dtype controls only the MXU operand dtype (accumulation and all
    element-wise math stay f32).  jnp.bfloat16 is recommended on v6e/v7x.
    """
    w1, b1, w1d, b1d, wfc, w2, b2 = params
    B, C, F, T = x.shape
    C_r = w1.shape[0]
    K = w1d.shape[2]
    CrF = C_r * F
    CF = C * F
    BT = B * T
    cd = compute_dtype

    # ---- host-side parameter re-layouts (tiny, one-time) ---------------------
    eyeF = jnp.eye(F, dtype=jnp.float32)
    w1big = jnp.kron(w1, eyeF).astype(cd)                    # (C_r*F, C*F)
    b1col = jnp.repeat(b1, F).reshape(CrF, 1)                # (C_r*F, 1) f32
    w1d_taps = jnp.transpose(w1d, (2, 0, 1)).astype(cd)      # (K, F, C_r*F)
    b1dcol = b1d.reshape(F, 1)                               # f32
    # Fold Freq_FC into the first Conv2D_2 half (1x1-conv associativity):
    # kron(w2a, I_F) @ kron(I_C, wfc) == kron(w2a, wfc).  T-independent weight,
    # one fewer matmul stage than v2, and no (F*T)^2 kron blow-up.
    w2a, w2b = w2[:, :C], w2[:, C:]
    wa = jnp.kron(w2a, wfc).astype(cd)                       # (C*F, C*F)
    wb = jnp.kron(w2b, eyeF).astype(cd)                      # (C*F, C*F)
    b2col = jnp.repeat(b2, F).reshape(CF, 1)                 # f32

    # Lane-dense input layout: rows = (c, f), lanes = (b, t).  Folding batch
    # into lanes raises lane occupancy (T -> B*T) and lets the whole batch run
    # as a single grid step (weights fetched exactly once).
    x_cf = jnp.transpose(x, (1, 2, 0, 3)).reshape(CF, BT)

    kernel = functools.partial(ftb_kernel, t_dim=T, n_batch=B, compute_dtype=cd)

    out_cf = pl.pallas_call(
        kernel,
        out_shape=jax.ShapeDtypeStruct((CF, BT), jnp.float32),
        grid=(1,),
        in_specs=[
            pl.BlockSpec((CF, BT), lambda i: (0, 0)),        # x, rows=(c,f)
            pl.BlockSpec((CrF, CF), lambda i: (0, 0)),       # kron(w1, I_F)
            pl.BlockSpec((CrF, 1), lambda i: (0, 0)),        # b1
            pl.BlockSpec((K, F, CrF), lambda i: (0, 0, 0)),  # conv1d taps
            pl.BlockSpec((F, 1), lambda i: (0, 0)),          # b1d
            pl.BlockSpec((CF, CF), lambda i: (0, 0)),        # kron(w2a, wfc)
            pl.BlockSpec((CF, CF), lambda i: (0, 0)),        # kron(w2b, I_F)
            pl.BlockSpec((CF, 1), lambda i: (0, 0)),         # b2
        ],
        out_specs=pl.BlockSpec((CF, BT), lambda i: (0, 0)),
        compiler_params=pltpu.CompilerParams(
            dimension_semantics=("arbitrary",)),
    )(x_cf, w1big, b1col, w1d_taps, b1dcol, wa, wb, b2col)

    # TODO(synk): for production-sized B/T, split the (b, t) lane axis into
    # 128-lane-multiple blocks and grid over them ("parallel") so v7x can shard
    # the work across its two TensorCores.
    return jnp.transpose(out_cf.reshape(C, F, B, T), (2, 0, 1, 3))


def reference_forward(x, params):
    """Pure-JAX reference (same folded parameters)."""
    w1, b1, w1d, b1d, wfc, w2, b2 = params
    B, C, F, T = x.shape
    C_r = w1.shape[0]
    K = w1d.shape[2]
    P = (K - 1) // 2

    out1 = jnp.einsum('rc,bcft->brft', w1, x) + b1[None, :, None, None]
    out1 = jnp.maximum(out1, 0.0)
    out1 = out1.reshape(B, C_r * F, T)
    out2 = lax.conv_general_dilated(
        out1, w1d, window_strides=(1,), padding=[(P, P)],
        dimension_numbers=('NCH', 'OIH', 'NCH'))
    out2 = jnp.maximum(out2 + b1d[None, :, None], 0.0)
    out3 = out2[:, None, :, :] * x
    out4 = jnp.einsum('gf,bcft->bcgt', wfc, out3)
    cat = jnp.concatenate([out4, x], axis=1)
    out = jnp.einsum('oc,bcft->boft', w2, cat) + b2[None, :, None, None]
    return jnp.maximum(out, 0.0)


def init_params(key, C, C_r, F_dim, K=9, eps=1e-5):
    ks = jax.random.split(key, 19)

    def n(i, shape, s=0.1):
        return s * jax.random.normal(ks[i], shape, jnp.float32)

    # Conv2D_1 (1x1) + BatchNorm2d(C_r)
    w1 = n(0, (C_r, C));                b1 = n(1, (C_r,))
    g1 = 1.0 + n(2, (C_r,));            be1 = n(3, (C_r,))
    m1 = n(4, (C_r,));                  v1 = 0.5 + jnp.abs(n(5, (C_r,), 1.0))
    # Conv1D_1 (k=9, pad=4) + BatchNorm1d(F)
    w1d = n(6, (F_dim, C_r * F_dim, K), 0.05)
    b1d = n(7, (F_dim,))
    g2 = 1.0 + n(8, (F_dim,));          be2 = n(9, (F_dim,))
    m2 = n(10, (F_dim,));               v2 = 0.5 + jnp.abs(n(11, (F_dim,), 1.0))
    # Freq_FC (Linear F->F, no bias)
    wfc = n(12, (F_dim, F_dim))
    # Conv2D_2 (1x1, 2C->C) + BatchNorm2d(C)
    w2 = n(13, (C, 2 * C));             b2 = n(14, (C,))
    g3 = 1.0 + n(15, (C,));             be3 = n(16, (C,))
    m3 = n(17, (C,));                   v3 = 0.5 + jnp.abs(n(18, (C,), 1.0))

    def fold(w, b, g, be, m, v):
        s = g / jnp.sqrt(v + eps)
        wf = w * s.reshape((-1,) + (1,) * (w.ndim - 1))
        bf = (b - m) * s + be
        return wf, bf

    w1f, b1f = fold(w1, b1, g1, be1, m1, v1)
    w1df, b1df = fold(w1d, b1d, g2, be2, m2, v2)
    w2f, b2f = fold(w2, b2, g3, be3, m3, v3)
    return (w1f, b1f, w1df, b1df, wfc, w2f, b2f)


if __name__ == "__main__":
    B, C, F_dim, T = 2, 4, 16, 16
    C_r = 5

    key = jax.random.PRNGKey(0)
    kx, kp = jax.random.split(key)
    x = jax.random.normal(kx, (B, C, F_dim, T), jnp.float32)
    params = init_params(kp, C, C_r, F_dim)

    ref = jax.block_until_ready(reference_forward(x, params))

    # f32 MXU operands: tight check.
    fwd = jax.jit(lambda x_, p_: real_ftb_pallas(x_, p_))
    out = jax.block_until_ready(fwd(x, params))
    assert out.shape == (B, C, F_dim, T)
    assert bool(jnp.all(jnp.isfinite(out)))
    assert bool(jnp.allclose(out, ref, rtol=1e-3, atol=1e-3)), "f32 mismatch vs reference"

    # bf16 MXU operands (recommended on v6e/v7x): looser tolerance, f32 accumulate.
    fwd_bf16 = jax.jit(
        lambda x_, p_: real_ftb_pallas(x_, p_, compute_dtype=jnp.bfloat16))
    out_bf16 = jax.block_until_ready(fwd_bf16(x, params))
    assert bool(jnp.all(jnp.isfinite(out_bf16)))
    assert bool(jnp.allclose(out_bf16, ref, rtol=5e-2, atol=5e-2)), "bf16 mismatch vs reference"

    print("KERNEL_OK")
</pallas_src>

<mosaic_0001>
module attributes {stable_mosaic.version = 11 : i64} {
  func.func @ftb_kernel(%arg0: i32, %arg1: memref<64x32xf32, #tpu.memory_space<vmem>>, %arg2: memref<80x64xf32, #tpu.memory_space<vmem>>, %arg3: memref<80x1xf32, #tpu.memory_space<vmem>>, %arg4: memref<9x16x80xf32, #tpu.memory_space<vmem>>, %arg5: memref<16x1xf32, #tpu.memory_space<vmem>>, %arg6: memref<64x64xf32, #tpu.memory_space<vmem>>, %arg7: memref<64x64xf32, #tpu.memory_space<vmem>>, %arg8: memref<64x1xf32, #tpu.memory_space<vmem>>, %arg9: memref<64x32xf32, #tpu.memory_space<vmem>>) attributes {dimension_semantics = [#tpu.dimension_semantics<arbitrary>], iteration_bounds = array<i64: 1>, scalar_prefetch = 0 : i64, scratch_operands = 0 : i64, tpu.core_type = #tpu.core_type<tc>, window_params = [{pipeline_mode = #tpu.pipeline_mode<synchronous>, transform_indices = @transform_0, window_bounds = array<i64: 64, 32>}, {pipeline_mode = #tpu.pipeline_mode<synchronous>, transform_indices = @transform_1, window_bounds = array<i64: 80, 64>}, {pipeline_mode = #tpu.pipeline_mode<synchronous>, transform_indices = @transform_2, window_bounds = array<i64: 80, 1>}, {pipeline_mode = #tpu.pipeline_mode<synchronous>, transform_indices = @transform_3, window_bounds = array<i64: 9, 16, 80>}, {pipeline_mode = #tpu.pipeline_mode<synchronous>, transform_indices = @transform_4, window_bounds = array<i64: 16, 1>}, {pipeline_mode = #tpu.pipeline_mode<synchronous>, transform_indices = @transform_5, window_bounds = array<i64: 64, 64>}, {pipeline_mode = #tpu.pipeline_mode<synchronous>, transform_indices = @transform_6, window_bounds = array<i64: 64, 64>}, {pipeline_mode = #tpu.pipeline_mode<synchronous>, transform_indices = @transform_7, window_bounds = array<i64: 64, 1>}, {pipeline_mode = #tpu.pipeline_mode<synchronous>, transform_indices = @transform_8, window_bounds = array<i64: 64, 32>}]} {
    %c0 = arith.constant 0 : index
    %c0_0 = arith.constant 0 : index
    %0 = vector.load %arg1[%c0, %c0_0] : memref<64x32xf32, #tpu.memory_space<vmem>>, vector<64x32xf32>
    %c0_1 = arith.constant 0 : index
    %c0_2 = arith.constant 0 : index
    %1 = vector.load %arg2[%c0_1, %c0_2] : memref<80x64xf32, #tpu.memory_space<vmem>>, vector<80x64xf32>
    %cst = arith.constant dense<0.000000e+00> : vector<80x32xf32>
    %2 = tpu.matmul %1, %0, %cst {dimension_numbers = #tpu.dot_dimension_numbers<[1], [0], [0], [1], [0, 0, 1, 1], [], []>} : vector<80x64xf32>, vector<64x32xf32>, vector<80x32xf32> -> vector<80x32xf32>
    %c0_3 = arith.constant 0 : index
    %c0_4 = arith.constant 0 : index
    %3 = vector.load %arg3[%c0_3, %c0_4] : memref<80x1xf32, #tpu.memory_space<vmem>>, vector<80x1xf32>
    %4 = vector.broadcast %3 : vector<80x1xf32> to vector<80x32xf32>
    %5 = arith.addf %2, %4 : vector<80x32xf32>
    %cst_5 = arith.constant 0.000000e+00 : f32
    %6 = vector.broadcast %cst_5 : f32 to vector<80x32xf32>
    %7 = arith.maximumf %5, %6 : vector<80x32xf32>
    %8 = vector.extract_strided_slice %7 {offsets = [0, 0], sizes = [80, 16], strides = [1, 1]} : vector<80x32xf32> to vector<80x16xf32>
    %cst_6 = arith.constant 0.000000e+00 : f32
    %9 = vector.broadcast %cst_6 : f32 to vector<80x4xf32>
    %10 = vector.extract_strided_slice %8 {offsets = [0, 0], sizes = [80, 12], strides = [1, 1]} : vector<80x16xf32> to vector<80x12xf32>
    %11 = tpu.concatenate %9, %10 in 1 : vector<80x4xf32>, vector<80x12xf32> -> vector<80x16xf32>
    %12 = vector.extract_strided_slice %7 {offsets = [0, 16], sizes = [80, 16], strides = [1, 1]} : vector<80x32xf32> to vector<80x16xf32>
    %cst_7 = arith.constant 0.000000e+00 : f32
    %13 = vector.broadcast %cst_7 : f32 to vector<80x4xf32>
    %14 = vector.extract_strided_slice %12 {offsets = [0, 0], sizes = [80, 12], strides = [1, 1]} : vector<80x16xf32> to vector<80x12xf32>
    %15 = tpu.concatenate %13, %14 in 1 : vector<80x4xf32>, vector<80x12xf32> -> vector<80x16xf32>
    %16 = tpu.concatenate %11, %15 in 1 : vector<80x16xf32>, vector<80x16xf32> -> vector<80x32xf32>
    %c0_8 = arith.constant 0 : index
    %c0_9 = arith.constant 0 : index
    %c0_10 = arith.constant 0 : index
    %17 = vector.load %arg4[%c0_8, %c0_9, %c0_10] : memref<9x16x80xf32, #tpu.memory_space<vmem>>, vector<1x16x80xf32>
    %18 = vector.shape_cast %17 : vector<1x16x80xf32> to vector<16x80xf32>
    %cst_11 = arith.constant dense<0.000000e+00> : vector<16x32xf32>
    %19 = tpu.matmul %18, %16, %cst_11 {dimension_numbers = #tpu.dot_dimension_numbers<[1], [0], [0], [1], [0, 0, 1, 1], [], []>} : vector<16x80xf32>, vector<80x32xf32>, vector<16x32xf32> -> vector<16x32xf32>
    %20 = vector.extract_strided_slice %7 {offsets = [0, 0], sizes = [80, 16], strides = [1, 1]} : vector<80x32xf32> to vector<80x16xf32>
    %cst_12 = arith.constant 0.000000e+00 : f32
    %21 = vector.broadcast %cst_12 : f32 to vector<80x3xf32>
    %22 = vector.extract_strided_slice %20 {offsets = [0, 0], sizes = [80, 13], strides = [1, 1]} : vector<80x16xf32> to vector<80x13xf32>
    %23 = tpu.concatenate %21, %22 in 1 : vector<80x3xf32>, vector<80x13xf32> -> vector<80x16xf32>
    %24 = vector.extract_strided_slice %7 {offsets = [0, 16], sizes = [80, 16], strides = [1, 1]} : vector<80x32xf32> to vector<80x16xf32>
    %cst_13 = arith.constant 0.000000e+00 : f32
    %25 = vector.broadcast %cst_13 : f32 to vector<80x3xf32>
    %26 = vector.extract_strided_slice %24 {offsets = [0, 0], sizes = [80, 13], strides = [1, 1]} : vector<80x16xf32> to vector<80x13xf32>
    %27 = tpu.concatenate %25, %26 in 1 : vector<80x3xf32>, vector<80x13xf32> -> vector<80x16xf32>
    %28 = tpu.concatenate %23, %27 in 1 : vector<80x16xf32>, vector<80x16xf32> -> vector<80x32xf32>
    %c1 = arith.constant 1 : index
    %c0_14 = arith.constant 0 : index
    %c0_15 = arith.constant 0 : index
    %29 = vector.load %arg4[%c1, %c0_14, %c0_15] : memref<9x16x80xf32, #tpu.memory_space<vmem>>, vector<1x16x80xf32>
    %30 = vector.shape_cast %29 : vector<1x16x80xf32> to vector<16x80xf32>
    %cst_16 = arith.constant dense<0.000000e+00> : vector<16x32xf32>
    %31 = tpu.matmul %30, %28, %cst_16 {dimension_numbers = #tpu.dot_dimension_numbers<[1], [0], [0], [1], [0, 0, 1, 1], [], []>} : vector<16x80xf32>, vector<80x32xf32>, vector<16x32xf32> -> vector<16x32xf32>
    %32 = arith.addf %19, %31 : vector<16x32xf32>
    %33 = vector.extract_strided_slice %7 {offsets = [0, 0], sizes = [80, 16], strides = [1, 1]} : vector<80x32xf32> to vector<80x16xf32>
    %cst_17 = arith.constant 0.000000e+00 : f32
    %34 = vector.broadcast %cst_17 : f32 to vector<80x2xf32>
    %35 = vector.extract_strided_slice %33 {offsets = [0, 0], sizes = [80, 14], strides = [1, 1]} : vector<80x16xf32> to vector<80x14xf32>
    %36 = tpu.concatenate %34, %35 in 1 : vector<80x2xf32>, vector<80x14xf32> -> vector<80x16xf32>
    %37 = vector.extract_strided_slice %7 {offsets = [0, 16], sizes = [80, 16], strides = [1, 1]} : vector<80x32xf32> to vector<80x16xf32>
    %cst_18 = arith.constant 0.000000e+00 : f32
    %38 = vector.broadcast %cst_18 : f32 to vector<80x2xf32>
    %39 = vector.extract_strided_slice %37 {offsets = [0, 0], sizes = [80, 14], strides = [1, 1]} : vector<80x16xf32> to vector<80x14xf32>
    %40 = tpu.concatenate %38, %39 in 1 : vector<80x2xf32>, vector<80x14xf32> -> vector<80x16xf32>
    %41 = tpu.concatenate %36, %40 in 1 : vector<80x16xf32>, vector<80x16xf32> -> vector<80x32xf32>
    %c2 = arith.constant 2 : index
    %c0_19 = arith.constant 0 : index
    %c0_20 = arith.constant 0 : index
    %42 = vector.load %arg4[%c2, %c0_19, %c0_20] : memref<9x16x80xf32, #tpu.memory_space<vmem>>, vector<1x16x80xf32>
    %43 = vector.shape_cast %42 : vector<1x16x80xf32> to vector<16x80xf32>
    %cst_21 = arith.constant dense<0.000000e+00> : vector<16x32xf32>
    %44 = tpu.matmul %43, %41, %cst_21 {dimension_numbers = #tpu.dot_dimension_numbers<[1], [0], [0], [1], [0, 0, 1, 1], [], []>} : vector<16x80xf32>, vector<80x32xf32>, vector<16x32xf32> -> vector<16x32xf32>
    %45 = arith.addf %32, %44 : vector<16x32xf32>
    %46 = vector.extract_strided_slice %7 {offsets = [0, 0], sizes = [80, 16], strides = [1, 1]} : vector<80x32xf32> to vector<80x16xf32>
    %cst_22 = arith.constant 0.000000e+00 : f32
    %47 = vector.broadcast %cst_22 : f32 to vector<80x1xf32>
    %48 = vector.extract_strided_slice %46 {offsets = [0, 0], sizes = [80, 15], strides = [1, 1]} : vector<80x16xf32> to vector<80x15xf32>
    %49 = tpu.concatenate %47, %48 in 1 : vector<80x1xf32>, vector<80x15xf32> -> vector<80x16xf32>
    %50 = vector.extract_strided_slice %7 {offsets = [0, 16], sizes = [80, 16], strides = [1, 1]} : vector<80x32xf32> to vector<80x16xf32>
    %cst_23 = arith.constant 0.000000e+00 : f32
    %51 = vector.broadcast %cst_23 : f32 to vector<80x1xf32>
    %52 = vector.extract_strided_slice %50 {offsets = [0, 0], sizes = [80, 15], strides = [1, 1]} : vector<80x16xf32> to vector<80x15xf32>
    %53 = tpu.concatenate %51, %52 in 1 : vector<80x1xf32>, vector<80x15xf32> -> vector<80x16xf32>
    %54 = tpu.concatenate %49, %53 in 1 : vector<80x16xf32>, vector<80x16xf32> -> vector<80x32xf32>
    %c3 = arith.constant 3 : index
    %c0_24 = arith.constant 0 : index
    %c0_25 = arith.constant 0 : index
    %55 = vector.load %arg4[%c3, %c0_24, %c0_25] : memref<9x16x80xf32, #tpu.memory_space<vmem>>, vector<1x16x80xf32>
    %56 = vector.shape_cast %55 : vector<1x16x80xf32> to vector<16x80xf32>
    %cst_26 = arith.constant dense<0.000000e+00> : vector<16x32xf32>
    %57 = tpu.matmul %56, %54, %cst_26 {dimension_numbers = #tpu.dot_dimension_numbers<[1], [0], [0], [1], [0, 0, 1, 1], [], []>} : vector<16x80xf32>, vector<80x32xf32>, vector<16x32xf32> -> vector<16x32xf32>
    %58 = arith.addf %45, %57 : vector<16x32xf32>
    %59 = vector.extract_strided_slice %7 {offsets = [0, 0], sizes = [80, 16], strides = [1, 1]} : vector<80x32xf32> to vector<80x16xf32>
    %60 = vector.extract_strided_slice %7 {offsets = [0, 16], sizes = [80, 16], strides = [1, 1]} : vector<80x32xf32> to vector<80x16xf32>
    %61 = tpu.concatenate %59, %60 in 1 : vector<80x16xf32>, vector<80x16xf32> -> vector<80x32xf32>
    %c4 = arith.constant 4 : index
    %c0_27 = arith.constant 0 : index
    %c0_28 = arith.constant 0 : index
    %62 = vector.load %arg4[%c4, %c0_27, %c0_28] : memref<9x16x80xf32, #tpu.memory_space<vmem>>, vector<1x16x80xf32>
    %63 = vector.shape_cast %62 : vector<1x16x80xf32> to vector<16x80xf32>
    %cst_29 = arith.constant dense<0.000000e+00> : vector<16x32xf32>
    %64 = tpu.matmul %63, %61, %cst_29 {dimension_numbers = #tpu.dot_dimension_numbers<[1], [0], [0], [1], [0, 0, 1, 1], [], []>} : vector<16x80xf32>, vector<80x32xf32>, vector<16x32xf32> -> vector<16x32xf32>
    %65 = arith.addf %58, %64 : vector<16x32xf32>
    %66 = vector.extract_strided_slice %7 {offsets = [0, 0], sizes = [80, 16], strides = [1, 1]} : vector<80x32xf32> to vector<80x16xf32>
    %67 = vector.extract_strided_slice %66 {offsets = [0, 1], sizes = [80, 15], strides = [1, 1]} : vector<80x16xf32> to vector<80x15xf32>
    %cst_30 = arith.constant 0.000000e+00 : f32
    %68 = vector.broadcast %cst_30 : f32 to vector<80x1xf32>
    %69 = tpu.concatenate %67, %68 in 1 : vector<80x15xf32>, vector<80x1xf32> -> vector<80x16xf32>
    %70 = vector.extract_strided_slice %7 {offsets = [0, 16], sizes = [80, 16], strides = [1, 1]} : vector<80x32xf32> to vector<80x16xf32>
    %71 = vector.extract_strided_slice %70 {offsets = [0, 1], sizes = [80, 15], strides = [1, 1]} : vector<80x16xf32> to vector<80x15xf32>
    %cst_31 = arith.constant 0.000000e+00 : f32
    %72 = vector.broadcast %cst_31 : f32 to vector<80x1xf32>
    %73 = tpu.concatenate %71, %72 in 1 : vector<80x15xf32>, vector<80x1xf32> -> vector<80x16xf32>
    %74 = tpu.concatenate %69, %73 in 1 : vector<80x16xf32>, vector<80x16xf32> -> vector<80x32xf32>
    %c5 = arith.constant 5 : index
    %c0_32 = arith.constant 0 : index
    %c0_33 = arith.constant 0 : index
    %75 = vector.load %arg4[%c5, %c0_32, %c0_33] : memref<9x16x80xf32, #tpu.memory_space<vmem>>, vector<1x16x80xf32>
    %76 = vector.shape_cast %75 : vector<1x16x80xf32> to vector<16x80xf32>
    %cst_34 = arith.constant dense<0.000000e+00> : vector<16x32xf32>
    %77 = tpu.matmul %76, %74, %cst_34 {dimension_numbers = #tpu.dot_dimension_numbers<[1], [0], [0], [1], [0, 0, 1, 1], [], []>} : vector<16x80xf32>, vector<80x32xf32>, vector<16x32xf32> -> vector<16x32xf32>
    %78 = arith.addf %65, %77 : vector<16x32xf32>
    %79 = vector.extract_strided_slice %7 {offsets = [0, 0], sizes = [80, 16], strides = [1, 1]} : vector<80x32xf32> to vector<80x16xf32>
    %80 = vector.extract_strided_slice %79 {offsets = [0, 2], sizes = [80, 14], strides = [1, 1]} : vector<80x16xf32> to vector<80x14xf32>
    %cst_35 = arith.constant 0.000000e+00 : f32
    %81 = vector.broadcast %cst_35 : f32 to vector<80x2xf32>
    %82 = tpu.concatenate %80, %81 in 1 : vector<80x14xf32>, vector<80x2xf32> -> vector<80x16xf32>
    %83 = vector.extract_strided_slice %7 {offsets = [0, 16], sizes = [80, 16], strides = [1, 1]} : vector<80x32xf32> to vector<80x16xf32>
    %84 = vector.extract_strided_slice %83 {offsets = [0, 2], sizes = [80, 14], strides = [1, 1]} : vector<80x16xf32> to vector<80x14xf32>
    %cst_36 = arith.constant 0.000000e+00 : f32
    %85 = vector.broadcast %cst_36 : f32 to vector<80x2xf32>
    %86 = tpu.concatenate %84, %85 in 1 : vector<80x14xf32>, vector<80x2xf32> -> vector<80x16xf32>
    %87 = tpu.concatenate %82, %86 in 1 : vector<80x16xf32>, vector<80x16xf32> -> vector<80x32xf32>
    %c6 = arith.constant 6 : index
    %c0_37 = arith.constant 0 : index
    %c0_38 = arith.constant 0 : index
    %88 = vector.load %arg4[%c6, %c0_37, %c0_38] : memref<9x16x80xf32, #tpu.memory_space<vmem>>, vector<1x16x80xf32>
    %89 = vector.shape_cast %88 : vector<1x16x80xf32> to vector<16x80xf32>
    %cst_39 = arith.constant dense<0.000000e+00> : vector<16x32xf32>
    %90 = tpu.matmul %89, %87, %cst_39 {dimension_numbers = #tpu.dot_dimension_numbers<[1], [0], [0], [1], [0, 0, 1, 1], [], []>} : vector<16x80xf32>, vector<80x32xf32>, vector<16x32xf32> -> vector<16x32xf32>
    %91 = arith.addf %78, %90 : vector<16x32xf32>
    %92 = vector.extract_strided_slice %7 {offsets = [0, 0], sizes = [80, 16], strides = [1, 1]} : vector<80x32xf32> to vector<80x16xf32>
    %93 = vector.extract_strided_slice %92 {offsets = [0, 3], sizes = [80, 13], strides = [1, 1]} : vector<80x16xf32> to vector<80x13xf32>
    %cst_40 = arith.constant 0.000000e+00 : f32
    %94 = vector.broadcast %cst_40 : f32 to vector<80x3xf32>
    %95 = tpu.concatenate %93, %94 in 1 : vector<80x13xf32>, vector<80x3xf32> -> vector<80x16xf32>
    %96 = vector.extract_strided_slice %7 {offsets = [0, 16], sizes = [80, 16], strides = [1, 1]} : vector<80x32xf32> to vector<80x16xf32>
    %97 = vector.extract_strided_slice %96 {offsets = [0, 3], sizes = [80, 13], strides = [1, 1]} : vector<80x16xf32> to vector<80x13xf32>
    %cst_41 = arith.constant 0.000000e+00 : f32
    %98 = vector.broadcast %cst_41 : f32 to vector<80x3xf32>
    %99 = tpu.concatenate %97, %98 in 1 : vector<80x13xf32>, vector<80x3xf32> -> vector<80x16xf32>
    %100 = tpu.concatenate %95, %99 in 1 : vector<80x16xf32>, vector<80x16xf32> -> vector<80x32xf32>
    %c7 = arith.constant 7 : index
    %c0_42 = arith.constant 0 : index
    %c0_43 = arith.constant 0 : index
    %101 = vector.load %arg4[%c7, %c0_42, %c0_43] : memref<9x16x80xf32, #tpu.memory_space<vmem>>, vector<1x16x80xf32>
    %102 = vector.shape_cast %101 : vector<1x16x80xf32> to vector<16x80xf32>
    %cst_44 = arith.constant dense<0.000000e+00> : vector<16x32xf32>
    %103 = tpu.matmul %102, %100, %cst_44 {dimension_numbers = #tpu.dot_dimension_numbers<[1], [0], [0], [1], [0, 0, 1, 1], [], []>} : vector<16x80xf32>, vector<80x32xf32>, vector<16x32xf32> -> vector<16x32xf32>
    %104 = arith.addf %91, %103 : vector<16x32xf32>
    %105 = vector.extract_strided_slice %7 {offsets = [0, 0], sizes = [80, 16], strides = [1, 1]} : vector<80x32xf32> to vector<80x16xf32>
    %106 = vector.extract_strided_slice %105 {offsets = [0, 4], sizes = [80, 12], strides = [1, 1]} : vector<80x16xf32> to vector<80x12xf32>
    %cst_45 = arith.constant 0.000000e+00 : f32
    %107 = vector.broadcast %cst_45 : f32 to vector<80x4xf32>
    %108 = tpu.concatenate %106, %107 in 1 : vector<80x12xf32>, vector<80x4xf32> -> vector<80x16xf32>
    %109 = vector.extract_strided_slice %7 {offsets = [0, 16], sizes = [80, 16], strides = [1, 1]} : vector<80x32xf32> to vector<80x16xf32>
    %110 = vector.extract_strided_slice %109 {offsets = [0, 4], sizes = [80, 12], strides = [1, 1]} : vector<80x16xf32> to vector<80x12xf32>
    %cst_46 = arith.constant 0.000000e+00 : f32
    %111 = vector.broadcast %cst_46 : f32 to vector<80x4xf32>
    %112 = tpu.concatenate %110, %111 in 1 : vector<80x12xf32>, vector<80x4xf32> -> vector<80x16xf32>
    %113 = tpu.concatenate %108, %112 in 1 : vector<80x16xf32>, vector<80x16xf32> -> vector<80x32xf32>
    %c8 = arith.constant 8 : index
    %c0_47 = arith.constant 0 : index
    %c0_48 = arith.constant 0 : index
    %114 = vector.load %arg4[%c8, %c0_47, %c0_48] : memref<9x16x80xf32, #tpu.memory_space<vmem>>, vector<1x16x80xf32>
    %115 = vector.shape_cast %114 : vector<1x16x80xf32> to vector<16x80xf32>
    %cst_49 = arith.constant dense<0.000000e+00> : vector<16x32xf32>
    %116 = tpu.matmul %115, %113, %cst_49 {dimension_numbers = #tpu.dot_dimension_numbers<[1], [0], [0], [1], [0, 0, 1, 1], [], []>} : vector<16x80xf32>, vector<80x32xf32>, vector<16x32xf32> -> vector<16x32xf32>
    %117 = arith.addf %104, %116 : vector<16x32xf32>
    %c0_50 = arith.constant 0 : index
    %c0_51 = arith.constant 0 : index
    %118 = vector.load %arg5[%c0_50, %c0_51] : memref<16x1xf32, #tpu.memory_space<vmem>>, vector<16x1xf32>
    %119 = vector.broadcast %118 : vector<16x1xf32> to vector<16x32xf32>
    %120 = arith.addf %117, %119 : vector<16x32xf32>
    %cst_52 = arith.constant 0.000000e+00 : f32
    %121 = vector.broadcast %cst_52 : f32 to vector<16x32xf32>
    %122 = arith.maximumf %120, %121 : vector<16x32xf32>
    %123 = tpu.concatenate %122, %122, %122, %122 in 0 : vector<16x32xf32>, vector<16x32xf32>, vector<16x32xf32>, vector<16x32xf32> -> vector<64x32xf32>
    %124 = arith.mulf %123, %0 : vector<64x32xf32>
    %c0_53 = arith.constant 0 : index
    %c0_54 = arith.constant 0 : index
    %125 = vector.load %arg6[%c0_53, %c0_54] : memref<64x64xf32, #tpu.memory_space<vmem>>, vector<64x64xf32>
    %cst_55 = arith.constant dense<0.000000e+00> : vector<64x32xf32>
    %126 = tpu.matmul %125, %124, %cst_55 {dimension_numbers = #tpu.dot_dimension_numbers<[1], [0], [0], [1], [0, 0, 1, 1], [], []>} : vector<64x64xf32>, vector<64x32xf32>, vector<64x32xf32> -> vector<64x32xf32>
    %c0_56 = arith.constant 0 : index
    %c0_57 = arith.constant 0 : index
    %127 = vector.load %arg7[%c0_56, %c0_57] : memref<64x64xf32, #tpu.memory_space<vmem>>, vector<64x64xf32>
    %cst_58 = arith.constant dense<0.000000e+00> : vector<64x32xf32>
    %128 = tpu.matmul %127, %0, %cst_58 {dimension_numbers = #tpu.dot_dimension_numbers<[1], [0], [0], [1], [0, 0, 1, 1], [], []>} : vector<64x64xf32>, vector<64x32xf32>, vector<64x32xf32> -> vector<64x32xf32>
    %129 = arith.addf %126, %128 : vector<64x32xf32>
    %c0_59 = arith.constant 0 : index
    %c0_60 = arith.constant 0 : index
    %130 = vector.load %arg8[%c0_59, %c0_60] : memref<64x1xf32, #tpu.memory_space<vmem>>, vector<64x1xf32>
    %131 = vector.broadcast %130 : vector<64x1xf32> to vector<64x32xf32>
    %132 = arith.addf %129, %131 : vector<64x32xf32>
    %cst_61 = arith.constant 0.000000e+00 : f32
    %133 = vector.broadcast %cst_61 : f32 to vector<64x32xf32>
    %134 = arith.maximumf %132, %133 : vector<64x32xf32>
    %c0_62 = arith.constant 0 : index
    %c0_63 = arith.constant 0 : index
    %135 = vector.load %arg9[%c0_62, %c0_63] : memref<64x32xf32, #tpu.memory_space<vmem>>, vector<64x32xf32>
    tpu.vector_store %arg9[%c0_62, %c0_63], %134 {strides = array<i32>} : memref<64x32xf32, #tpu.memory_space<vmem>>, vector<64x32xf32>,
    return
  }
  func.func @transform_0(%arg0: i32) -> (i32, i32) {
    %c0_i32 = arith.constant 0 : i32
    %c0_i32_0 = arith.constant 0 : i32
    %c0_i32_1 = arith.constant 0 : i32
    return %c0_i32, %c0_i32_0 : i32, i32
  }
  func.func @transform_1(%arg0: i32) -> (i32, i32) {
    %c0_i32 = arith.constant 0 : i32
    %c0_i32_0 = arith.constant 0 : i32
    %c0_i32_1 = arith.constant 0 : i32
    return %c0_i32, %c0_i32_0 : i32, i32
  }
  func.func @transform_2(%arg0: i32) -> (i32, i32) {
    %c0_i32 = arith.constant 0 : i32
    %c0_i32_0 = arith.constant 0 : i32
    %c0_i32_1 = arith.constant 0 : i32
    return %c0_i32, %c0_i32_0 : i32, i32
  }
  func.func @transform_3(%arg0: i32) -> (i32, i32, i32) {
    %c0_i32 = arith.constant 0 : i32
    %c0_i32_0 = arith.constant 0 : i32
    %c0_i32_1 = arith.constant 0 : i32
    %c0_i32_2 = arith.constant 0 : i32
    return %c0_i32, %c0_i32_0, %c0_i32_1 : i32, i32, i32
  }
  func.func @transform_4(%arg0: i32) -> (i32, i32) {
    %c0_i32 = arith.constant 0 : i32
    %c0_i32_0 = arith.constant 0 : i32
    %c0_i32_1 = arith.constant 0 : i32
    return %c0_i32, %c0_i32_0 : i32, i32
  }
  func.func @transform_5(%arg0: i32) -> (i32, i32) {
    %c0_i32 = arith.constant 0 : i32
    %c0_i32_0 = arith.constant 0 : i32
    %c0_i32_1 = arith.constant 0 : i32
    return %c0_i32, %c0_i32_0 : i32, i32
  }
  func.func @transform_6(%arg0: i32) -> (i32, i32) {
    %c0_i32 = arith.constant 0 : i32
    %c0_i32_0 = arith.constant 0 : i32
    %c0_i32_1 = arith.constant 0 : i32
    return %c0_i32, %c0_i32_0 : i32, i32
  }
  func.func @transform_7(%arg0: i32) -> (i32, i32) {
    %c0_i32 = arith.constant 0 : i32
    %c0_i32_0 = arith.constant 0 : i32
    %c0_i32_1 = arith.constant 0 : i32
    return %c0_i32, %c0_i32_0 : i32, i32
  }
  func.func @transform_8(%arg0: i32) -> (i32, i32) {
    %c0_i32 = arith.constant 0 : i32
    %c0_i32_0 = arith.constant 0 : i32
    %c0_i32_1 = arith.constant 0 : i32
    return %c0_i32, %c0_i32_0 : i32, i32
  }
}

</mosaic_0001>

<bundles_post_ra>
// kernel: _lambda_.1
= control target key start
LH: loop header
LB: loop body
LE: loop exit
PB: predicated region body
PF: predicated region fallthrough
CT: control target
= control target key end

     0   :  { %vm107_vm0 = vcmask 523264   ;;  %v3859_v3 = vmov 0   ;;  %s3861_s16 = smov 113   ;;  %s3862_s17 = smov 110   ;;  %vm951_vm1 = vcmask 7168   ;;  %vm1254_vm2 = vcmask 121856   ;;  %s5055_s0 = inlined_call_operand.vmem [shape: f32[64,32], index: 0, kind: input, shape index: {}]   ;;  %s5056_s1 = inlined_call_operand.vmem [shape: f32[80,64], index: 1, kind: input, shape index: {}]   ;;  %s5057_s2 = inlined_call_operand.vmem [shape: f32[80,1], index: 2, kind: input, shape index: {}]   ;;  %s5058_s3 = inlined_call_operand.vmem [shape: f32[9,16,80], index: 3, kind: input, shape index: {}]   ;;  %s5059_s4 = inlined_call_operand.vmem [shape: f32[16,1], index: 4, kind: input, shape index: {}]   ;;  %s5060_s7 = inlined_call_operand.vmem [shape: f32[64,1], index: 7, kind: input, shape index: {}]   ;;  %s5061_s6 = inlined_call_operand.vmem [shape: f32[64,64], index: 6, kind: input, shape index: {}]   ;;  %s5062_s5 = inlined_call_operand.vmem [shape: f32[64,64], index: 5, kind: input, shape index: {}]   ;;  %s5063_s8 = inlined_call_operand.vmem [shape: f32[64,32], index: 8, kind: output, shape index: {}]  }
   0x1   :  { %v29_v0 = vld [vmem:[%s5055_s0] sm:$0xff]  ;;  %v30_v1 = vld [vmem:[%s5055_s0 + $0x8] sm:$0xff]  ;;  %v31_v2 = vld [vmem:[%s5055_s0 + $0x10] sm:$0xff]  ;;  %3249 = vset.pattern.permute.xlu0 %v3859_v3  ;;  %3250 = vset.pattern.permute.xlu1 %v3859_v3  ;;  %s3863_s18 = smov 1   ;;  %s3864_s19 = smov 109   ;;  %vm1471_vm3 = vcmask 113664  }
   0x2   :  { %v3931_v4 = vpack.c.bf16 %v30_v1, %v29_v0  ;;  %v32_v5 = vld [vmem:[%s5055_s0 + $0x18] sm:$0xff]  ;;  %v33_v7 = vld [vmem:[%s5055_s0 + $0x20] sm:$0xff]  ;;  %v34_v8 = vld [vmem:[%s5055_s0 + $0x28] sm:$0xff]  ;;  %s3865_s20 = smov 115   ;;  %s3866_s21 = smov 108   ;;  %vm437_vm4 = vcmask 23552  }
   0x3   :  { %v3936_v6 = vpack.c.bf16 %v32_v5, %v31_v2  ;;  %v37_v9 = vld [vmem:[%s5056_s1] sm:$0xff]  ;;  %v3951_v10 = vpack.c.bf16 %v34_v8, %v33_v7  ;;  %v35_v11 = vld [vmem:[%s5055_s0 + $0x30] sm:$0xff]  ;;  %v36_v12 = vld [vmem:[%s5055_s0 + $0x38] sm:$0xff]  ;;  %s3867_s22 = smov 116   ;;  %s3868_s23 = smov 127   ;;  %vm303_vm5 = vcmask 31744  }
   0x4   :  { %2980 = vmatprep.subr.bf16.mxu0 %v3931_v4  ;;  %2701 = vmatprep.mubr.msk.f32.mxu0 %vm107_vm0, %v37_v9  ;;  %v47_v13 = vld [vmem:[%s5057_s2] sm:$0xff]  ;;  %v49_v14 = vld [vmem:[%s5057_s2 + $0x10] sm:$0xff]  ;;  %v48_v15 = vld [vmem:[%s5057_s2 + $0x8] sm:$0xff]  ;;  %v3970_v16 = vpack.c.bf16 %v36_v12, %v35_v11  ;;  %s3869_s24 = smov 114   ;;  %s3870_s25 = smov 126   ;;  %vm541_vm6 = vcmask 654336  }
   0x5   :  { %2982 = vmatpush3.bf16.msra.mxu0 %v3931_v4  ;;  %59 = vperm.xlu0 %3249, %v47_v13   ;;  %v50_v17 = vld [vmem:[%s5057_s2 + $0x18] sm:$0xff]  ;;  %v51_v18 = vld [vmem:[%s5057_s2 + $0x20] sm:$0xff]  ;;  %v52_v19 = vld [vmem:[%s5057_s2 + $0x28] sm:$0xff]  ;;  %s3871_s26 = smov 3   ;;  %s3872_s27 = smov 16   ;;  %vm1688_vm7 = vcmask 105472  }
   0x6   :  { %2984 = vmatprep.subr.bf16.mxu0 %v3936_v6  ;;  %69 = vperm.xlu1 %3250, %v49_v14   ;;  %v38_v20 = vld [vmem:[%s5056_s1 + $0x8] sm:$0xff]  ;;  %v53_v21 = vld [vmem:[%s5057_s2 + $0x30] sm:$0xff]  ;;  %v54_v23 = vld [vmem:[%s5057_s2 + $0x38] sm:$0xff]  ;;  %s3873_s30 = smov 4   ;;  %s3874_s9 = smov 125   ;;  %vm394_vm8 = vcmask 130048  }
   0x7   :  { %v39_v22 = vld [vmem:[%s5056_s1 + $0x10] sm:$0xff]  ;;  %v40_v24 = vld [vmem:[%s5056_s1 + $0x18] sm:$0xff]  ;;  %v55_v25 = vld [vmem:[%s5057_s2 + $0x40] sm:$0xff]  ;;  %s3875_s10 = smov 2   ;;  %vm734_vm9 = vcmask 15360   ;;  %vm1905_vm10 = vcmask 97280  }
   0x8   :  { %v41_v26 = vld [vmem:[%s5056_s1 + $0x20] sm:$0xff]  ;;  %v56_v27 = vld [vmem:[%s5057_s2 + $0x48] sm:$0xff]  ;;  %v43_v29 = vld [vmem:[%s5056_s1 + $0x30] sm:$0xff]  ;;  %s3876_s12 = smov 124   ;;  %vm2454_vm11 = vcmask 261120  }
   0x9   :  { %2986 = vmatpush3.bf16.msra.mxu0 %v3936_v6  ;;  %64 = vperm.xlu0 %3249, %v48_v15   ;;  %v42_v28 = vld [vmem:[%s5056_s1 + $0x28] sm:$0xff]  ;;  %v44_v30 = vld [vmem:[%s5056_s1 + $0x38] sm:$0xff]  ;;  %v45_v31 = vld [vmem:[%s5056_s1 + $0x40] sm:$0xff] }
   0xa   :  { %2988 = vmatprep.subr.bf16.mxu0 %v3951_v10  ;;  %74 = vperm.xlu1 %3250, %v50_v17   ;;  %v46_v32 = vld [vmem:[%s5056_s1 + $0x48] sm:$0xff]  ;;  %s3860_s1 = smov 111  }
   0xd   :  { %2990 = vmatpush3.bf16.msra.mxu0 %v3951_v10  ;;  %79 = vperm.xlu0 %3249, %v51_v18  }
   0xe   :  { %2992 = vmatprep.subr.bf16.mxu0 %v3970_v16  ;;  %84 = vperm.xlu1 %3250, %v52_v19  }
  0x11   :  { %2994 = vmatpush3.bf16.msra.mxu0 %v3970_v16  ;;  %89 = vperm.xlu0 %3249, %v53_v21  }
  0x12   :  { %94 = vperm.xlu1 %3250, %v54_v23  }
  0x14   :  { %2702 = vmatmul.mubr.msk.f32.vlgmr.msra.gmra.mrb[0].mxu0 %vm107_vm0, %v38_v20 }
  0x15   :  { %2704 = vmatprep.mubr.msk.f32.mxu0 %vm107_vm0, %v39_v22  ;;  %99 = vperm.xlu0 %3249, %v55_v25  }
  0x16   :  { %104 = vperm.xlu1 %3250, %v56_v27  }
  0x18   :  { %2705 = vmatmul.mubr.msk.f32.gmra.mrb[2].mxu0 %vm107_vm0, %v40_v24 }
  0x19   :  { %2707 = vmatprep.mubr.msk.f32.mxu0 %vm107_vm0, %v41_v26 }
  0x1c   :  { %2708 = vmatmul.mubr.msk.f32.gmra.mrb[4].mxu0 %vm107_vm0, %v42_v28 }
  0x1d   :  { %2710 = vmatprep.mubr.msk.f32.mxu0 %vm107_vm0, %v43_v29 }
  0x20   :  { %2711 = vmatmul.mubr.msk.f32.gmra.mrb[6].mxu0 %vm107_vm0, %v44_v30 }
  0x21   :  { %2713 = vmatprep.mubr.msk.f32.mxu0 %vm107_vm0, %v45_v31 }
  0x24   :  { %2714 = vmatmul.mubr.msk.f32.gmra.mrb[8].mxu0 %vm107_vm0, %v46_v32 }
  0x84   :  { %v60_v34 = vpop.permute.xlu0 %59 }
  0x85   :  { %v70_v33 = vpop.permute.xlu1 %69 }
  0x88   :  { %v65_v36 = vpop.permute.xlu0 %64 }
  0x89   :  { %v75_v35 = vpop.permute.xlu1 %74 }
  0x8c   :  { %v80_v45 = vpop.permute.xlu0 %79 }
  0x8d   :  { %v85_v41 = vpop.permute.xlu1 %84 }
  0x90   :  { %v90_v58 = vpop.permute.xlu0 %89 }
  0x91   :  { %v95_v53 = vpop.permute.xlu1 %94 }
  0x94   :  { %v100_v8 = vpop.permute.xlu0 %99 }
  0x95   :  { %v105_v1 = vpop.permute.xlu1 %104 }
  0xe7   :  { %v2703_v37 = vpop.f32.mrb[0].mxu0 }
  0xe8   :  { %v4032_v38 = vadd.f32 %v2703_v37, %v65_v36  ;;  %v204_v39 = vpop.f32.mrb[1].mxu0 }
  0xe9   :  { %v205_v40 = vadd.f32 %v204_v39, %v60_v34 }
  0xea   :  { %v254_v42 = vmax.f32 %v4032_v38, 0.0 }
  0xeb   :  { %v253_v43 = vmax.f32 %v205_v40, 0.0  ;;  %v2706_v44 = vpop.f32.mrb[2].mxu0 }
  0xec   :  { %v220_v46 = vadd.f32 %v2706_v44, %v75_v35  ;;  %v214_v47 = vpop.f32.mrb[3].mxu0 }
  0xed   :  { %v215_v48 = vadd.f32 %v214_v47, %v70_v33  ;;  %v4035_v49 = vpack.i.bf16 %v254_v42, %v253_v43  ;;  %v4069_v18 = vpack.c.bf16 %v254_v42, %v253_v43 }
  0xee   :  { %v256_v50 = vmax.f32 %v220_v46, 0.0 }
  0xef   :  { %v255_v51 = vmax.f32 %v215_v48, 0.0  ;;  %v2709_v52 = vpop.f32.mrb[4].mxu0  ;;  %3257 = vrot.lane.b32.xlu1 %v4035_v49, %s3860_s1  ;;  %3252 = vrot.lane.b32.xlu0 %v4035_v49, %s3861_s16 }
  0xf0   :  { %v230_v54 = vadd.f32 %v2709_v52, %v85_v41  ;;  %v224_v55 = vpop.f32.mrb[5].mxu0 }
  0xf1   :  { %v225_v56 = vadd.f32 %v224_v55, %v80_v45  ;;  %v4041_v57 = vpack.i.bf16 %v256_v50, %v255_v51  ;;  %v4071_v19 = vpack.c.bf16 %v256_v50, %v255_v51 }
  0xf2   :  { %v258_v59 = vmax.f32 %v230_v54, 0.0 }
  0xf3   :  { %v257_v60 = vmax.f32 %v225_v56, 0.0  ;;  %v2712_v61 = vpop.f32.mrb[6].mxu0  ;;  %3272 = vrot.lane.b32.xlu1 %v4035_v49, %s3862_s17  ;;  %3262 = vrot.lane.b32.xlu0 %v4035_v49, %s3863_s18 }
  0xf4   :  { %v240_v62 = vadd.f32 %v2712_v61, %v95_v53  ;;  %v234_v63 = vpop.f32.mrb[7].mxu0 }
  0xf5   :  { %v235_v0 = vadd.f32 %v234_v63, %v90_v58  ;;  %v4047_v2 = vpack.i.bf16 %v258_v59, %v257_v60  ;;  %v4073_v20 = vpack.c.bf16 %v258_v59, %v257_v60 }
  0xf6   :  { %v260_v3 = vmax.f32 %v240_v62, 0.0 }
  0xf7   :  { %v259_v5 = vmax.f32 %v235_v0, 0.0  ;;  %v2715_v7 = vpop.f32.mrb[8].mxu0  ;;  %3282 = vrot.lane.b32.xlu1 %v4035_v49, %s3864_s19  ;;  %3267 = vrot.lane.b32.xlu0 %v4035_v49, %s3865_s20 }
  0xf8   :  { %v250_v9 = vadd.f32 %v2715_v7, %v105_v1  ;;  %v244_v11 = vpop.f32.mrb[9].mxu0 }
  0xf9   :  { %v245_v12 = vadd.f32 %v244_v11, %v100_v8  ;;  %v4053_v13 = vpack.i.bf16 %v260_v3, %v259_v5  ;;  %v4075_v21 = vpack.c.bf16 %v260_v3, %v259_v5 }
  0xfa   :  { %v262_v14 = vmax.f32 %v250_v9, 0.0 }
  0xfb   :  { %v261_v15 = vmax.f32 %v245_v12, 0.0  ;;  %3297 = vrot.lane.b32.xlu1 %v4035_v49, %s3866_s21  ;;  %3277 = vrot.lane.b32.xlu0 %v4035_v49, %s3867_s22 }
  0xfd   :  { %v4059_v17 = vpack.i.bf16 %v262_v14, %v261_v15  ;;  %v4081_v22 = vpack.c.bf16 %v262_v14, %v261_v15 }
  0xff   :  { %3302 = vrot.lane.b32.xlu1 %v4041_v57, %s3861_s16  ;;  %3287 = vrot.lane.b32.xlu0 %v4035_v49, %s3868_s23 }
 0x103   :  { %3322 = vrot.lane.b32.xlu1 %v4041_v57, %s3862_s17  ;;  %3292 = vrot.lane.b32.xlu0 %v4035_v49, %s3869_s24 }
 0x107   :  { %3332 = vrot.lane.b32.xlu1 %v4041_v57, %s3864_s19  ;;  %3307 = vrot.lane.b32.xlu0 %v4041_v57, %s3860_s1 }
 0x10b   :  { %3347 = vrot.lane.b32.xlu1 %v4047_v2, %s3860_s1  ;;  %3312 = vrot.lane.b32.xlu0 %v4041_v57, %s3863_s18 }
 0x10f   :  { %3362 = vrot.lane.b32.xlu1 %v4047_v2, %s3862_s17  ;;  %3317 = vrot.lane.b32.xlu0 %v4041_v57, %s3865_s20 }
 0x113   :  { %3372 = vrot.lane.b32.xlu1 %v4047_v2, %s3864_s19  ;;  %3327 = vrot.lane.b32.xlu0 %v4041_v57, %s3867_s22 }
 0x117   :  { %3377 = vrot.lane.b32.xlu1 %v4053_v13, %s3861_s16  ;;  %3337 = vrot.lane.b32.xlu0 %v4041_v57, %s3868_s23 }
 0x11b   :  { %3397 = vrot.lane.b32.xlu1 %v4053_v13, %s3862_s17  ;;  %3342 = vrot.lane.b32.xlu0 %v4047_v2, %s3861_s16 }
 0x11f   :  { %3407 = vrot.lane.b32.xlu1 %v4053_v13, %s3864_s19  ;;  %3352 = vrot.lane.b32.xlu0 %v4047_v2, %s3863_s18 }
 0x123   :  { %3422 = vrot.lane.b32.xlu1 %v4041_v57, %s3866_s21  ;;  %3357 = vrot.lane.b32.xlu0 %v4047_v2, %s3865_s20 }
 0x127   :  { %3437 = vrot.lane.b32.xlu1 %v4047_v2, %s3866_s21  ;;  %3367 = vrot.lane.b32.xlu0 %v4047_v2, %s3867_s22 }
 0x12b   :  { %3452 = vrot.lane.b32.xlu1 %v4053_v13, %s3866_s21  ;;  %3382 = vrot.lane.b32.xlu0 %v4053_v13, %s3860_s1 }
 0x12f   :  { %3462 = vrot.lane.b32.xlu1 %v4035_v49, %s3870_s25  ;;  %3387 = vrot.lane.b32.xlu0 %v4053_v13, %s3863_s18 }
 0x133   :  { %3472 = vrot.lane.b32.xlu1 %v4041_v57, %s3870_s25  ;;  %3392 = vrot.lane.b32.xlu0 %v4053_v13, %s3865_s20 }
 0x137   :  { %3482 = vrot.lane.b32.xlu1 %v4047_v2, %s3870_s25  ;;  %3402 = vrot.lane.b32.xlu0 %v4053_v13, %s3867_s22 }
 0x13b   :  { %3492 = vrot.lane.b32.xlu1 %v4059_v17, %s3860_s1  ;;  %3412 = vrot.lane.b32.xlu0 %v4059_v17, %s3861_s16 }
 0x13f   :  { %3507 = vrot.lane.b32.xlu1 %v4059_v17, %s3862_s17  ;;  %3417 = vrot.lane.b32.xlu0 %v4041_v57, %s3869_s24 }
 0x143   :  { %3517 = vrot.lane.b32.xlu1 %v4059_v17, %s3864_s19  ;;  %3427 = vrot.lane.b32.xlu0 %v4047_v2, %s3868_s23 }
 0x147   :  { %3532 = vrot.lane.b32.xlu1 %v4059_v17, %s3866_s21  ;;  %3432 = vrot.lane.b32.xlu0 %v4047_v2, %s3869_s24 }
 0x14b   :  { %3442 = vrot.lane.b32.xlu0 %v4053_v13, %s3868_s23 }
 0x14f   :  { %3447 = vrot.lane.b32.xlu0 %v4053_v13, %s3869_s24 }
 0x153   :  { %3457 = vrot.lane.b32.xlu0 %v4035_v49, %s3871_s26 }
 0x157   :  { %3467 = vrot.lane.b32.xlu0 %v4041_v57, %s3871_s26 }
 0x15b   :  { %3477 = vrot.lane.b32.xlu0 %v4047_v2, %s3871_s26 }
 0x15f   :  { %3487 = vrot.lane.b32.xlu0 %v4053_v13, %s3871_s26 }
 0x161   :  { %v3258_v23 = vpop.permute.xlu1 %3257  ;;  %v3253_v24 = vpop.permute.xlu0 %3252 }
 0x162   :  { %v3260_v25 = vunpack.i.h.bf16 %v3258_v23  ;;  %v3259_v26 = vunpack.i.l.bf16 %v3258_v23  ;;  %v3255_v27 = vunpack.i.h.bf16 %v3253_v24  ;;  %v3254_v28 = vunpack.i.l.bf16 %v3253_v24 }
 0x163   :  { %3497 = vrot.lane.b32.xlu0 %v4059_v17, %s3863_s18 }
 0x164   :  { %v992_v29 = vsel %vm951_vm1, 0.0, %v3254_v28  ;;  %v993_v30 = vsel %vm951_vm1, 0.0, %v3255_v27  ;;  %v1295_v36 = vsel %vm1254_vm2, %v3259_v26, 0.0  ;;  %v1296_v37 = vsel %vm1254_vm2, %v3260_v25, 0.0 }
 0x165   :  { %v3273_v31 = vpop.permute.xlu1 %3272  ;;  %v4163_v32 = vpop.permute.xlu0 %3262  ;;  %v3536_v33 = vpack.i.bf16 %v993_v30, %v992_v29  ;;  %v3541_v40 = vpack.i.bf16 %v1296_v37, %v1295_v36 }
 0x166   :  { %v3275_v34 = vunpack.i.h.bf16 %v3273_v31  ;;  %v3274_v35 = vunpack.i.l.bf16 %v3273_v31 }
 0x167   :  { %3502 = vrot.lane.b32.xlu0 %v4059_v17, %s3865_s20  ;;  %3537 = vrot.lane.b32.xlu1 %v3536_v33, %s3872_s27 }
 0x168   :  { %v1512_v41 = vsel %vm1471_vm3, %v3274_v35, 0.0  ;;  %v1513_v42 = vsel %vm1471_vm3, %v3275_v34, 0.0 }
 0x169   :  { %v4170_v38 = vpop.permute.xlu1 %3282  ;;  %v3268_v39 = vpop.permute.xlu0 %3267  ;;  %v3551_v45 = vpack.i.bf16 %v1513_v42, %v1512_v41 }
 0x16a   :  { %v3270_v46 = vunpack.i.h.bf16 %v3268_v39  ;;  %v3269_v47 = vunpack.i.l.bf16 %v3268_v39 }
 0x16b   :  { %3512 = vrot.lane.b32.xlu0 %v4059_v17, %s3867_s22  ;;  %3542 = vrot.lane.b32.xlu1 %v3541_v40, %s3872_s27 }
 0x16c   :  { %v478_v53 = vsel %vm437_vm4, 0.0, %v3269_v47  ;;  %v479_v54 = vsel %vm437_vm4, 0.0, %v3270_v46 }
 0x16d   :  { %v4177_v43 = vpop.permute.xlu1 %3297  ;;  %v4179_v44 = vpop.permute.xlu0 %3277  ;;  %v3546_v60 = vpack.i.bf16 %v479_v54, %v478_v53 }
 0x16f   :  { %3522 = vrot.lane.b32.xlu0 %v4059_v17, %s3868_s23  ;;  %3552 = vrot.lane.b32.xlu1 %v3551_v45, %s3872_s27 }
 0x171   :  { %v3303_v48 = vpop.permute.xlu1 %3302  ;;  %v4184_v50 = vpop.permute.xlu0 %3287 }
 0x172   :  { %v3305_v51 = vunpack.i.h.bf16 %v3303_v48  ;;  %v3304_v52 = vunpack.i.l.bf16 %v3303_v48 }
 0x173   :  { %3527 = vrot.lane.b32.xlu0 %v4059_v17, %s3869_s24 }
 0x174   :  { %v994_v55 = vsel %vm951_vm1, 0.0, %v3304_v52  ;;  %v995_v56 = vsel %vm951_vm1, 0.0, %v3305_v51 }
 0x175   :  { %v3323_v58 = vpop.permute.xlu1 %3322  ;;  %v4192_v59 = vpop.permute.xlu0 %3292  ;;  %v3556_v61 = vpack.i.bf16 %v995_v56, %v994_v55 }
 0x176   :  { %v3325_v0 = vunpack.i.h.bf16 %v3323_v58  ;;  %v3324_v1 = vunpack.i.l.bf16 %v3323_v58 }
 0x177   :  { %3547 = vrot.lane.b32.xlu0 %v3546_v60, %s3872_s27  ;;  %3557 = vrot.lane.b32.xlu1 %v3556_v61, %s3872_s27 }
 0x178   :  { %v1514_v14 = vsel %vm1471_vm3, %v3324_v1, 0.0  ;;  %v1515_v15 = vsel %vm1471_vm3, %v3325_v0, 0.0 }
 0x179   :  { %v4196_v62 = vpop.permute.xlu1 %3332  ;;  %v3308_v63 = vpop.permute.xlu0 %3307  ;;  %v3571_v25 = vpack.i.bf16 %v1515_v15, %v1514_v14 }
 0x17a   :  { %v3310_v3 = vunpack.i.h.bf16 %v3308_v63  ;;  %v3309_v5 = vunpack.i.l.bf16 %v3308_v63 }
 0x17c   :  { %v1297_v7 = vsel %vm1254_vm2, %v3309_v5, 0.0  ;;  %v1298_v8 = vsel %vm1254_vm2, %v3310_v3, 0.0 }
 0x17d   :  { %v3348_v9 = vpop.permute.xlu1 %3347  ;;  %v4200_v11 = vpop.permute.xlu0 %3312  ;;  %v3561_v12 = vpack.i.bf16 %v1298_v8, %v1297_v7 }
 0x17e   :  { %v3350_v37 = vunpack.i.h.bf16 %v3348_v9  ;;  %v3349_v39 = vunpack.i.l.bf16 %v3348_v9 }
 0x17f   :  { %3562 = vrot.lane.b32.xlu1 %v3561_v12, %s3872_s27 }
 0x180   :  { %v1299_v52 = vsel %vm1254_vm2, %v3349_v39, 0.0  ;;  %v1300_v53 = vsel %vm1254_vm2, %v3350_v37, 0.0 }
 0x181   :  { %v3363_v23 = vpop.permute.xlu1 %3362  ;;  %v3318_v24 = vpop.permute.xlu0 %3317  ;;  %v3581_v56 = vpack.i.bf16 %v1300_v53, %v1299_v52  ;;  %v3280_v52 = vunpack.i.h.bf16 %v4179_v44  ;;  %v3279_v53 = vunpack.i.l.bf16 %v4179_v44  ;;  %v2487_v44 = vld [vmem:[%s5058_s3 + $0x30] sm:$0xff] }
 0x182   :  { %v3320_v26 = vunpack.i.h.bf16 %v3318_v24  ;;  %v3319_v27 = vunpack.i.l.bf16 %v3318_v24  ;;  %v3365_v46 = vunpack.i.h.bf16 %v3363_v23  ;;  %v3364_v47 = vunpack.i.l.bf16 %v3363_v23  ;;  %2805 = vmatprep.mubr.msk.f32.mxu1 %vm541_vm6, %v2487_v44 }
 0x183   :  { %3572 = vrot.lane.b32.xlu1 %v3571_v25, %s3872_s27  ;;  %v3334_v44 = vunpack.i.l.bf16 %v4196_v62 }
 0x184   :  { %v480_v28 = vsel %vm437_vm4, 0.0, %v3319_v27  ;;  %v481_v29 = vsel %vm437_vm4, 0.0, %v3320_v26  ;;  %v1516_v58 = vsel %vm1471_vm3, %v3364_v47, 0.0  ;;  %v1517_v60 = vsel %vm1471_vm3, %v3365_v46, 0.0 }
 0x185   :  { %v4208_v30 = vpop.permute.xlu0 %3327  ;;  %v3566_v31 = vpack.i.bf16 %v481_v29, %v480_v28  ;;  %v4210_v33 = vpop.permute.xlu1 %3372  ;;  %v3591_v12 = vpack.i.bf16 %v1517_v60, %v1516_v58 }
 0x187   :  { %3567 = vrot.lane.b32.xlu0 %v3566_v31, %s3872_s27 }
 0x189   :  { %v4213_v34 = vpop.permute.xlu0 %3337  ;;  %v3378_v35 = vpop.permute.xlu1 %3377 }
 0x18a   :  { %v3380_v61 = vunpack.i.h.bf16 %v3378_v35  ;;  %v3379_v63 = vunpack.i.l.bf16 %v3378_v35 }
 0x18c   :  { %v998_v14 = vsel %vm951_vm1, 0.0, %v3379_v63  ;;  %v999_v15 = vsel %vm951_vm1, 0.0, %v3380_v61 }
 0x18d   :  { %v3343_v36 = vpop.permute.xlu0 %3342  ;;  %v4221_v54 = vpop.permute.xlu1 %3397  ;;  %v3596_v24 = vpack.i.bf16 %v999_v15, %v998_v14  ;;  %v3330_v15 = vunpack.i.h.bf16 %v4208_v30 }
 0x18e   :  { %v3345_v40 = vunpack.i.h.bf16 %v3343_v36  ;;  %v3344_v41 = vunpack.i.l.bf16 %v3343_v36 }
 0x190   :  { %v996_v42 = vsel %vm951_vm1, 0.0, %v3344_v41  ;;  %v997_v45 = vsel %vm951_vm1, 0.0, %v3345_v40 }
 0x191   :  { %v4217_v48 = vpop.permute.xlu0 %3352  ;;  %v3576_v51 = vpack.i.bf16 %v997_v45, %v996_v42  ;;  %v4229_v7 = vpop.permute.xlu1 %3407 }
 0x193   :  { %3577 = vrot.lane.b32.xlu1 %v3576_v51, %s3872_s27 }
 0x195   :  { %v3358_v55 = vpop.permute.xlu0 %3357  ;;  %v4237_v27 = vpop.permute.xlu1 %3422 }
 0x196   :  { %v3360_v0 = vunpack.i.h.bf16 %v3358_v55  ;;  %v3359_v1 = vunpack.i.l.bf16 %v3358_v55 }
 0x197   :  { %3582 = vrot.lane.b32.xlu1 %v3581_v56, %s3872_s27 }
 0x198   :  { %v482_v3 = vsel %vm437_vm4, 0.0, %v3359_v1  ;;  %v483_v5 = vsel %vm437_vm4, 0.0, %v3360_v0  ;;  %v3400_v1 = vunpack.i.h.bf16 %v4221_v54 }
 0x199   :  { %v4231_v8 = vpop.permute.xlu0 %3367  ;;  %v3586_v9 = vpack.i.bf16 %v483_v5, %v482_v3  ;;  %v4245_v36 = vpop.permute.xlu1 %3437  ;;  %v3399_v3 = vunpack.i.l.bf16 %v4221_v54  ;;  %v344_v5 = vsel %vm303_vm5, 0.0, %v3279_v53 }
 0x19b   :  { %3587 = vrot.lane.b32.xlu0 %v3586_v9, %s3872_s27  ;;  %3592 = vrot.lane.b32.xlu1 %v3591_v12, %s3872_s27  ;;  %v345_v9 = vsel %vm303_vm5, 0.0, %v3280_v52  ;;  %v1518_v54 = vsel %vm1471_vm3, %v3399_v3, 0.0 }
 0x19c   :  { %v3646_v14 = vpack.i.bf16 %v345_v9, %v344_v5 }
 0x19d   :  { %v3383_v23 = vpop.permute.xlu0 %3382  ;;  %v4251_v47 = vpop.permute.xlu1 %3452 }
 0x19e   :  { %v3385_v25 = vunpack.i.h.bf16 %v3383_v23  ;;  %v3384_v26 = vunpack.i.l.bf16 %v3383_v23  ;;  %v3329_v23 = vunpack.i.l.bf16 %v4208_v30 }
 0x19f   :  { %3597 = vrot.lane.b32.xlu1 %v3596_v24, %s3872_s27  ;;  %v1519_v24 = vsel %vm1471_vm3, %v3400_v1, 0.0 }
 0x1a0   :  { %v1301_v28 = vsel %vm1254_vm2, %v3384_v26, 0.0  ;;  %v1302_v29 = vsel %vm1254_vm2, %v3385_v25, 0.0 }
 0x1a1   :  { %v4242_v31 = vpop.permute.xlu0 %3387  ;;  %v3601_v35 = vpack.i.bf16 %v1302_v29, %v1301_v28  ;;  %v4260_v61 = vpop.permute.xlu1 %3462  ;;  %v3621_v28 = vpack.i.bf16 %v1519_v24, %v1518_v54  ;;  %v346_v29 = vsel %vm303_vm5, 0.0, %v3329_v23  ;;  %v1731_v23 = vsel %vm1688_vm7, %v3334_v44, 0.0 }
 0x1a2   :  { %v3410_v44 = vunpack.i.h.bf16 %v4229_v7 }
 0x1a3   :  { %3602 = vrot.lane.b32.xlu1 %v3601_v35, %s3872_s27  ;;  %v347_v35 = vsel %vm303_vm5, 0.0, %v3330_v15 }
 0x1a5   :  { %v3393_v37 = vpop.permute.xlu0 %3392  ;;  %v4281_v25 = vpop.permute.xlu1 %3472 }
 0x1a6   :  { %v3395_v39 = vunpack.i.h.bf16 %v3393_v37  ;;  %v3394_v40 = vunpack.i.l.bf16 %v3393_v37 }
 0x1a8   :  { %v485_v41 = vsel %vm437_vm4, 0.0, %v3395_v39  ;;  %v484_v42 = vsel %vm437_vm4, 0.0, %v3394_v40  ;;  %v3666_v39 = vpack.i.bf16 %v347_v35, %v346_v29  ;;  %v3285_v40 = vunpack.i.h.bf16 %v4170_v38 }
 0x1a9   :  { %v4249_v45 = vpop.permute.xlu0 %3402  ;;  %v3616_v46 = vpack.i.bf16 %v485_v41, %v484_v42  ;;  %v4293_v30 = vpop.permute.xlu1 %3482  ;;  %v3284_v41 = vunpack.i.l.bf16 %v4170_v38  ;;  %v3370_v42 = vunpack.i.h.bf16 %v4231_v8  ;;  %v3374_v29 = vunpack.i.l.bf16 %v4210_v33 }
 0x1aa   :  { %v1730_v38 = vsel %vm1688_vm7, %v3285_v40, 0.0  ;;  %v3405_v1 = vunpack.i.h.bf16 %v4249_v45  ;;  %v3404_v3 = vunpack.i.l.bf16 %v4249_v45 }
 0x1ab   :  { %3617 = vrot.lane.b32.xlu0 %v3616_v46, %s3872_s27  ;;  %v3369_v46 = vunpack.i.l.bf16 %v4231_v8  ;;  %v349_v52 = vsel %vm303_vm5, 0.0, %v3370_v42  ;;  %v1733_v42 = vsel %vm1688_vm7, %v3374_v29, 0.0 }
 0x1ac   :  { %v350_v15 = vsel %vm303_vm5, 0.0, %v3404_v3 }
 0x1ad   :  { %v3413_v51 = vpop.permute.xlu0 %3412  ;;  %v348_v53 = vsel %vm303_vm5, 0.0, %v3369_v46 }
 0x1ae   :  { %v3415_v55 = vunpack.i.h.bf16 %v3413_v51  ;;  %v3414_v56 = vunpack.i.l.bf16 %v3413_v51  ;;  %v3686_v8 = vpack.i.bf16 %v349_v52, %v348_v53 }
 0x1af   :  { %3627 = vrot.lane.b32.xlu0 %v4059_v17, %s3871_s26 }
 0x1b0   :  { %v1001_v58 = vsel %vm951_vm1, 0.0, %v3415_v55  ;;  %v1000_v60 = vsel %vm951_vm1, 0.0, %v3414_v56  ;;  %v1729_v55 = vsel %vm1688_vm7, %v3284_v41, 0.0  ;;  %v3493_v56 = vpop.permute.xlu1 %3492 }
 0x1b1   :  { %v4262_v63 = vpop.permute.xlu0 %3417  ;;  %v3606_v0 = vpack.i.bf16 %v1001_v58, %v1000_v60  ;;  %v3651_v60 = vpack.i.bf16 %v1730_v38, %v1729_v55  ;;  %v3495_v40 = vunpack.i.h.bf16 %v3493_v56  ;;  %v3494_v41 = vunpack.i.l.bf16 %v3493_v56 }
 0x1b2   :  { %v3265_v56 = vunpack.i.h.bf16 %v4163_v32 }
 0x1b3   :  { %3637 = vrot.lane.b32.xlu0 %v4035_v49, %s3873_s30  ;;  %3607 = vrot.lane.b32.xlu1 %v3606_v0, %s3872_s27  ;;  %v3335_v0 = vunpack.i.h.bf16 %v4196_v62  ;;  %v1304_v55 = vsel %vm1254_vm2, %v3495_v40, 0.0  ;;  %v1303_v38 = vsel %vm1254_vm2, %v3494_v41, 0.0  ;;  %v2477_v41 = vld [vmem:[%s5058_s3 + $0x10] sm:$0xff] }
 0x1b4   :  { %v4322_v5 = vpop.permute.xlu1 %3507  ;;  %v3701_v3 = vpack.i.bf16 %v1304_v55, %v1303_v38  ;;  %2736 = vmatprep.mubr.msk.f32.mxu0 %vm541_vm6, %v2477_v41 }
 0x1b5   :  { %v4275_v12 = vpop.permute.xlu0 %3427  ;;  %v1732_v62 = vsel %vm1688_vm7, %v3335_v0, 0.0  ;;  %v3294_v0 = vunpack.i.l.bf16 %v4192_v59 }
 0x1b6   :  { %v3671_v24 = vpack.i.bf16 %v1732_v62, %v1731_v23 }
 0x1b7   :  { %3647 = vrot.lane.b32.xlu0 %v3646_v14, %s3872_s27  ;;  %3612 = vrot.lane.b32.xlu1 %v4053_v13, %s3870_s25  ;;  %v351_v14 = vsel %vm303_vm5, 0.0, %v3405_v1  ;;  %v3409_v1 = vunpack.i.l.bf16 %v4229_v7 }
 0x1b8   :  { %v3711_v45 = vpack.i.bf16 %v351_v14, %v350_v15  ;;  %v4338_v35 = vpop.permute.xlu1 %3517 }
 0x1b9   :  { %v4286_v26 = vpop.permute.xlu0 %3432 }
 0x1bb   :  { %3657 = vrot.lane.b32.xlu0 %v4041_v57, %s3873_s30  ;;  %3622 = vrot.lane.b32.xlu1 %v3621_v28, %s3872_s27  ;;  %v3375_v28 = vunpack.i.h.bf16 %v4210_v33 }
 0x1bc   :  { %v4350_v33 = vpop.permute.xlu1 %3532 }
 0x1bd   :  { %v4295_v37 = vpop.permute.xlu0 %3442  ;;  %v1734_v46 = vsel %vm1688_vm7, %v3375_v28, 0.0  ;;  %v953_v28 = vsel %vm951_vm1, 0.0, %v3265_v56  ;;  %v775_v56 = vsel %vm734_vm9, 0.0, %v3294_v0 }
 0x1be   :  { %v3691_v53 = vpack.i.bf16 %v1734_v46, %v1733_v42 }
 0x1bf   :  { %3667 = vrot.lane.b32.xlu0 %v3666_v39, %s3872_s27  ;;  %3632 = vrot.lane.b32.xlu1 %v4059_v17, %s3870_s25 }
 0x1c1   :  { %v4304_v51 = vpop.permute.xlu0 %3447 }
 0x1c3   :  { %3677 = vrot.lane.b32.xlu0 %v4047_v2, %s3873_s30  ;;  %3642 = vrot.lane.b32.xlu1 %v4035_v49, %s3874_s9 }
 0x1c5   :  { %v4314_v58 = vpop.permute.xlu0 %3457 }
 0x1c7   :  { %3687 = vrot.lane.b32.xlu0 %v3686_v8, %s3872_s27  ;;  %3652 = vrot.lane.b32.xlu1 %v3651_v60, %s3872_s27  ;;  %v3264_v8 = vunpack.i.l.bf16 %v4163_v32  ;;  %v3295_v60 = vunpack.i.h.bf16 %v4192_v59 }
 0x1c9   :  { %v4324_v9 = vpop.permute.xlu0 %3467  ;;  %v776_v38 = vsel %vm734_vm9, 0.0, %v3295_v60 }
 0x1cb   :  { %3697 = vrot.lane.b32.xlu0 %v4053_v13, %s3873_s30  ;;  %3662 = vrot.lane.b32.xlu1 %v4041_v57, %s3874_s9 }
 0x1cd   :  { %v4334_v54 = vpop.permute.xlu0 %3477 }
 0x1cf   :  { %3712 = vrot.lane.b32.xlu0 %v3711_v45, %s3872_s27  ;;  %3672 = vrot.lane.b32.xlu1 %v3671_v24, %s3872_s27  ;;  %v952_v24 = vsel %vm951_vm1, 0.0, %v3264_v8  ;;  %v1736_v8 = vsel %vm1688_vm7, %v3410_v44, 0.0  ;;  %v3420_v44 = vunpack.i.h.bf16 %v4262_v63 }
 0x1d1   :  { %v4342_v39 = vpop.permute.xlu0 %3487  ;;  %v778_v41 = vsel %vm734_vm9, 0.0, %v3420_v44 }
 0x1d3   :  { %3722 = vrot.lane.b32.xlu0 %v4059_v17, %s3873_s30  ;;  %3682 = vrot.lane.b32.xlu1 %v4047_v2, %s3874_s9 }
 0x1d5   :  { %v4352_v52 = vpop.permute.xlu0 %3497 }
 0x1d7   :  { %3732 = vrot.lane.b32.xlu0 %v4035_v49, %s3875_s10  ;;  %3692 = vrot.lane.b32.xlu1 %v3691_v53, %s3872_s27 }
 0x1d9   :  { %v3503_v14 = vpop.permute.xlu0 %3502  ;;  %v3538_v15 = vpop.permute.xlu1 %3537 }
 0x1da   :  { %v3505_v23 = vunpack.i.h.bf16 %v3503_v14  ;;  %v3504_v32 = vunpack.i.l.bf16 %v3503_v14  ;;  %v3540_v62 = vunpack.i.h.bf16 %v3538_v15  ;;  %v3539_v45 = vunpack.i.l.bf16 %v3538_v15 }
 0x1db   :  { %3702 = vrot.lane.b32.xlu1 %v3701_v3, %s3872_s27  ;;  %v1735_v3 = vsel %vm1688_vm7, %v3409_v1, 0.0  ;;  %v3465_v14 = vunpack.i.h.bf16 %v4260_v61  ;;  %v3464_v15 = vunpack.i.l.bf16 %v4260_v61  ;;  %v3419_v1 = vunpack.i.l.bf16 %v4262_v63 }
 0x1dc   :  { %v487_v59 = vsel %vm437_vm4, 0.0, %v3505_v23  ;;  %v486_v29 = vsel %vm437_vm4, 0.0, %v3504_v32  ;;  %v1042_v7 = vsel %vm394_vm8, %v952_v24, %v3539_v45  ;;  %v1043_v40 = vsel %vm394_vm8, %v953_v28, %v3540_v62 }
 0x1dd   :  { %v3741_v42 = vpack.i.bf16 %v487_v59, %v486_v29  ;;  %v4375_v46 = vpop.permute.xlu0 %3512  ;;  %v4377_v53 = vpop.permute.xlu1 %3542  ;;  %v3055_v55 = vpack.c.bf16 %v1043_v40, %v1042_v7  ;;  %v3746_v23 = vpack.i.bf16 %v776_v38, %v775_v56  ;;  %v3716_v32 = vpack.i.bf16 %v1736_v8, %v1735_v3 }
 0x1de   :  { %v1473_v61 = vsel %vm1471_vm3, %v3465_v14, 0.0  ;;  %v1472_v24 = vsel %vm1471_vm3, %v3464_v15, 0.0  ;;  %v3510_v28 = vunpack.i.h.bf16 %v4322_v5  ;;  %v3509_v7 = vunpack.i.l.bf16 %v4322_v5 }
 0x1df   :  { %3742 = vrot.lane.b32.xlu0 %v3741_v42, %s3872_s27  ;;  %3707 = vrot.lane.b32.xlu1 %v4053_v13, %s3874_s9  ;;  %v777_v42 = vsel %vm734_vm9, 0.0, %v3419_v1  ;;  %v3314_v38 = vunpack.i.l.bf16 %v4200_v11  ;;  %v3460_v56 = vunpack.i.h.bf16 %v4314_v58  ;;  %v3459_v8 = vunpack.i.l.bf16 %v4314_v58 }
 0x1e0   :  { %3056 = vmatprep.subr.bf16.mxu1 %v3055_v55  ;;  %v3300_v5 = vunpack.i.h.bf16 %v4177_v43  ;;  %v3299_v3 = vunpack.i.l.bf16 %v4177_v43  ;;  %v1521_v14 = vsel %vm1471_vm3, %v3510_v28, 0.0  ;;  %v1520_v15 = vsel %vm1471_vm3, %v3509_v7, 0.0 }
 0x1e1   :  { %3058 = vmatpush3.bf16.msra.mxu1 %v3055_v55  ;;  %v4389_v60 = vpop.permute.xlu0 %3522  ;;  %v3553_v0 = vpop.permute.xlu1 %3552  ;;  %v3315_v55 = vunpack.i.h.bf16 %v4200_v11  ;;  %v3771_v11 = vpack.i.bf16 %v778_v41, %v777_v42  ;;  %v3514_v58 = vunpack.i.l.bf16 %v4375_v46  ;;  %v439_v43 = vsel %vm437_vm4, 0.0, %v3460_v56 }
 0x1e2   :  { %v3555_v62 = vunpack.i.h.bf16 %v3553_v0  ;;  %v3554_v45 = vunpack.i.l.bf16 %v3553_v0  ;;  %v438_v28 = vsel %vm437_vm4, 0.0, %v3459_v8  ;;  %v3751_v41 = vpack.i.bf16 %v1521_v14, %v1520_v15 }
 0x1e3   :  { %3747 = vrot.lane.b32.xlu0 %v3746_v23, %s3872_s27  ;;  %3717 = vrot.lane.b32.xlu1 %v3716_v32, %s3872_s27  ;;  %v3515_v23 = vunpack.i.h.bf16 %v4375_v46  ;;  %v3434_v56 = vunpack.i.l.bf16 %v4286_v26  ;;  %v3425_v14 = vunpack.i.h.bf16 %v4237_v27  ;;  %v3424_v15 = vunpack.i.l.bf16 %v4237_v27 }
 0x1e4   :  { %v1562_v59 = vsel %vm394_vm8, %v1472_v24, %v3554_v45  ;;  %v1563_v29 = vsel %vm394_vm8, %v1473_v61, %v3555_v62  ;;  %v955_v61 = vsel %vm951_vm1, 0.0, %v3315_v55  ;;  %v954_v24 = vsel %vm951_vm1, 0.0, %v3314_v38 }
 0x1e5   :  { %v4401_v40 = vpop.permute.xlu0 %3527  ;;  %v4403_v63 = vpack.c.bf16 %v1563_v29, %v1562_v59  ;;  %v3435_v38 = vunpack.i.h.bf16 %v4286_v26  ;;  %v353_v8 = vsel %vm303_vm5, 0.0, %v3515_v23  ;;  %v1949_v27 = vsel %vm1905_vm10, %v3425_v14, 0.0 }
 0x1e7   :  { %3762 = vrot.lane.b32.xlu0 %v4041_v57, %s3875_s10  ;;  %3727 = vrot.lane.b32.xlu1 %v4059_v17, %s3874_s9 }
 0x1e9   :  { %v3548_v32 = vpop.permute.xlu0 %3547  ;;  %v3558_v0 = vpop.permute.xlu1 %3557 }
 0x1ea   :  { %v3550_v44 = vunpack.i.h.bf16 %v3548_v32  ;;  %v3549_v1 = vunpack.i.l.bf16 %v3548_v32  ;;  %v3560_v62 = vunpack.i.h.bf16 %v3558_v0  ;;  %v3559_v45 = vunpack.i.l.bf16 %v3558_v0 }
 0x1eb   :  { %3772 = vrot.lane.b32.xlu0 %v3771_v11, %s3872_s27  ;;  %3737 = vrot.lane.b32.xlu1 %v4035_v49, %s3876_s12  ;;  %v352_v11 = vsel %vm303_vm5, 0.0, %v3514_v58  ;;  %v1947_v49 = vsel %vm1905_vm10, %v3300_v5, 0.0  ;;  %v1946_v32 = vsel %vm1905_vm10, %v3299_v3, 0.0  ;;  %v780_v5 = vsel %vm734_vm9, 0.0, %v3435_v38 }
 0x1ec   :  { %v528_v46 = vsel %vm394_vm8, %v438_v28, %v3549_v1  ;;  %v529_v59 = vsel %vm394_vm8, %v439_v43, %v3550_v44  ;;  %v1044_v29 = vsel %vm394_vm8, %v954_v24, %v3559_v45  ;;  %v1045_v7 = vsel %vm394_vm8, %v955_v61, %v3560_v62 }
 0x1ed   :  { %v2995_v42 = vpack.c.bf16 %v529_v59, %v528_v46  ;;  %v3059_v55 = vpack.c.bf16 %v1045_v7, %v1044_v29  ;;  %v3791_v26 = vpack.i.bf16 %v353_v8, %v352_v11  ;;  %v3756_v58 = vpack.i.bf16 %v1947_v49, %v1946_v32 }
 0x1ee   :  { %v779_v3 = vsel %vm734_vm9, 0.0, %v3434_v56  ;;  %v3475_v0 = vunpack.i.h.bf16 %v4281_v25  ;;  %v3474_v44 = vunpack.i.l.bf16 %v4281_v25  ;;  %v1948_v1 = vsel %vm1905_vm10, %v3424_v15, 0.0 }
 0x1ef   :  { %3782 = vrot.lane.b32.xlu0 %v4047_v2, %s3875_s10  ;;  %2996 = vmatprep.subr.bf16.mxu0 %v2995_v42  ;;  %v3796_v62 = vpack.i.bf16 %v780_v5, %v779_v3  ;;  %v3450_v61 = vunpack.i.h.bf16 %v4304_v51  ;;  %v3449_v24 = vunpack.i.l.bf16 %v4304_v51  ;;  %v3470_v59 = vunpack.i.h.bf16 %v4324_v9 }
 0x1f0   :  { %3752 = vrot.lane.b32.xlu1 %v3751_v41, %s3872_s27  ;;  %3060 = vmatprep.subr.bf16.mxu1 %v3059_v55  ;;  %v1475_v46 = vsel %vm1471_vm3, %v3475_v0, 0.0  ;;  %v1474_v25 = vsel %vm1471_vm3, %v3474_v44, 0.0  ;;  %v3469_v29 = vunpack.i.l.bf16 %v4324_v9  ;;  %v3776_v51 = vpack.i.bf16 %v1949_v27, %v1948_v1 }
 0x1f1   :  { %2998 = vmatpush3.bf16.msra.mxu0 %v2995_v42  ;;  %3062 = vmatpush3.bf16.msra.mxu1 %v3059_v55  ;;  %v4443_v23 = vpop.permute.xlu1 %3562  ;;  %v782_v38 = vsel %vm734_vm9, 0.0, %v3450_v61  ;;  %v781_v56 = vsel %vm734_vm9, 0.0, %v3449_v24  ;;  %v3520_v9 = vunpack.i.h.bf16 %v4338_v35  ;;  %v3519_v49 = vunpack.i.l.bf16 %v4338_v35 }
 0x1f2   :  { %v440_v32 = vsel %vm437_vm4, 0.0, %v3469_v29  ;;  %v3530_v5 = vunpack.i.h.bf16 %v4401_v40  ;;  %v3529_v3 = vunpack.i.l.bf16 %v4401_v40  ;;  %v3440_v35 = vunpack.i.h.bf16 %v4245_v36 }
 0x1f3   :  { %3792 = vrot.lane.b32.xlu0 %v3791_v26, %s3872_s27  ;;  %v3821_v26 = vpack.i.bf16 %v782_v38, %v781_v56  ;;  %v3439_v0 = vunpack.i.l.bf16 %v4245_v36  ;;  %v1738_v44 = vsel %vm1688_vm7, %v3520_v9, 0.0  ;;  %v1737_v27 = vsel %vm1688_vm7, %v3519_v49, 0.0 }
 0x1f4   :  { %3757 = vrot.lane.b32.xlu1 %v3756_v58, %s3872_s27  ;;  %v3801_v1 = vpack.i.bf16 %v1738_v44, %v1737_v27  ;;  %v783_v40 = vsel %vm734_vm9, 0.0, %v3529_v3  ;;  %v3354_v36 = vunpack.i.l.bf16 %v4217_v48  ;;  %v1951_v61 = vsel %vm1905_vm10, %v3440_v35, 0.0 }
 0x1f5   :  { %v3573_v45 = vpop.permute.xlu1 %3572  ;;  %v1950_v24 = vsel %vm1905_vm10, %v3439_v0, 0.0  ;;  %v3485_v56 = vunpack.i.h.bf16 %v4293_v30  ;;  %v3480_v49 = vunpack.i.h.bf16 %v4334_v54  ;;  %v3534_v27 = vunpack.i.l.bf16 %v4350_v33 }
 0x1f6   :  { %v3575_v43 = vunpack.i.h.bf16 %v3573_v45  ;;  %v3574_v28 = vunpack.i.l.bf16 %v3573_v45  ;;  %v3355_v45 = vunpack.i.h.bf16 %v4217_v48 }
 0x1f7   :  { %3797 = vrot.lane.b32.xlu0 %v3796_v62, %s3872_s27  ;;  %v784_v62 = vsel %vm734_vm9, 0.0, %v3530_v5 }
 0x1f8   :  { %3767 = vrot.lane.b32.xlu1 %v4041_v57, %s3876_s12  ;;  %v1564_v7 = vsel %vm394_vm8, %v1474_v25, %v3574_v28  ;;  %v1565_v41 = vsel %vm394_vm8, %v1475_v46, %v3575_v43  ;;  %v441_v57 = vsel %vm437_vm4, 0.0, %v3470_v59  ;;  %v3455_v43 = vunpack.i.h.bf16 %v4251_v47 }
 0x1f9   :  { %v3568_v42 = vpop.permute.xlu0 %3567  ;;  %v4464_v55 = vpack.c.bf16 %v1565_v41, %v1564_v7  ;;  %v3841_v28 = vpack.i.bf16 %v784_v62, %v783_v40  ;;  %v3806_v25 = vpack.i.bf16 %v1951_v61, %v1950_v24  ;;  %v957_v48 = vsel %vm951_vm1, 0.0, %v3355_v45 }
 0x1fa   :  { %v3570_v8 = vunpack.i.h.bf16 %v3568_v42  ;;  %v3569_v11 = vunpack.i.l.bf16 %v3568_v42  ;;  %v956_v7 = vsel %vm951_vm1, 0.0, %v3354_v36  ;;  %v1953_v41 = vsel %vm1905_vm10, %v3455_v43, 0.0 }
 0x1fb   :  { %3812 = vrot.lane.b32.xlu0 %v4053_v13, %s3875_s10 }
 0x1fc   :  { %3777 = vrot.lane.b32.xlu1 %v3776_v51, %s3872_s27  ;;  %v530_v14 = vsel %vm394_vm8, %v440_v32, %v3569_v11  ;;  %v531_v15 = vsel %vm394_vm8, %v441_v57, %v3570_v8  ;;  %v2092_v51 = vld [vmem:[%s5059_s4] sm:$0xff]  ;;  %v3484_v8 = vunpack.i.l.bf16 %v4293_v30  ;;  %v3479_v57 = vunpack.i.l.bf16 %v4334_v54 }
 0x1fd   :  { %v2999_v58 = vpack.c.bf16 %v531_v15, %v530_v14  ;;  %v2390_v14 = vld [vmem:[%s5060_s7] sm:$0xff]  ;;  %v3390_v30 = vunpack.i.h.bf16 %v4242_v31  ;;  %v3389_v15 = vunpack.i.l.bf16 %v4242_v31  ;;  %v2392_v31 = vld [vmem:[%s5060_s7 + $0x10] sm:$0xff] }
 0x1fe   :  { %v442_v62 = vsel %vm437_vm4, 0.0, %v3479_v57 }
 0x1ff   :  { %3822 = vrot.lane.b32.xlu0 %v3821_v26, %s3872_s27  ;;  %3000 = vmatprep.subr.bf16.mxu0 %v2999_v58  ;;  %v1477_v26 = vsel %vm1471_vm3, %v3485_v56, 0.0  ;;  %v3489_v56 = vunpack.i.l.bf16 %v4342_v39 }
 0x200   :  { %3787 = vrot.lane.b32.xlu1 %v4047_v2, %s3876_s12  ;;  %3002 = vmatpush3.bf16.msra.mxu0 %v2999_v58  ;;  %v3454_v2 = vunpack.i.l.bf16 %v4251_v47  ;;  %v1476_v58 = vsel %vm1471_vm3, %v3484_v8, 0.0 }
 0x202   :  { %v1952_v38 = vsel %vm1905_vm10, %v3454_v2, 0.0 }
 0x203   :  { %3832 = vrot.lane.b32.xlu0 %v4059_v17, %s3875_s10  ;;  %v3826_v32 = vpack.i.bf16 %v1953_v41, %v1952_v38  ;;  %v3490_v38 = vunpack.i.h.bf16 %v4342_v39 }
 0x204   :  { %3802 = vrot.lane.b32.xlu1 %v3801_v1, %s3872_s27  ;;  %v443_v1 = vsel %vm437_vm4, 0.0, %v3480_v49 }
 0x205   :  { %v3578_v46 = vpop.permute.xlu1 %3577 }
 0x206   :  { %v3580_v59 = vunpack.i.h.bf16 %v3578_v46  ;;  %v3579_v29 = vunpack.i.l.bf16 %v3578_v46  ;;  %v959_v46 = vsel %vm951_vm1, 0.0, %v3390_v30 }
 0x207   :  { %3842 = vrot.lane.b32.xlu0 %v3841_v28, %s3872_s27 }
 0x208   :  { %3807 = vrot.lane.b32.xlu1 %v3806_v25, %s3872_s27  ;;  %v1046_v47 = vsel %vm394_vm8, %v956_v7, %v3579_v29  ;;  %v1047_v42 = vsel %vm394_vm8, %v957_v48, %v3580_v59  ;;  %v958_v25 = vsel %vm951_vm1, 0.0, %v3389_v15  ;;  %v1954_v29 = vsel %vm1905_vm10, %v3534_v27, 0.0  ;;  %v2394_v48 = vld [vmem:[%s5060_s7 + $0x20] sm:$0xff] }
 0x209   :  { %v4510_v11 = vpop.permute.xlu1 %3582  ;;  %v3063_v9 = vpack.c.bf16 %v1047_v42, %v1046_v47  ;;  %v2093_v42 = vld [vmem:[%s5059_s4 + $0x8] sm:$0xff] }
 0x20b   :  { %2096 = vperm.xlu0 %3249, %v2092_v51   ;;  %3064 = vmatprep.subr.bf16.mxu1 %v3063_v9 }
 0x20c   :  { %3817 = vrot.lane.b32.xlu1 %v4053_v13, %s3876_s12  ;;  %3066 = vmatpush3.bf16.msra.mxu1 %v3063_v9  ;;  %v3535_v13 = vunpack.i.h.bf16 %v4350_v33  ;;  %v2391_v9 = vld [vmem:[%s5060_s7 + $0x8] sm:$0xff] }
 0x20d   :  { %v3588_v54 = vpop.permute.xlu0 %3587  ;;  %v3593_v5 = vpop.permute.xlu1 %3592 }
 0x20e   :  { %v3590_v3 = vunpack.i.h.bf16 %v3588_v54  ;;  %v3589_v35 = vunpack.i.l.bf16 %v3588_v54  ;;  %v3595_v0 = vunpack.i.h.bf16 %v3593_v5  ;;  %v3594_v44 = vunpack.i.l.bf16 %v3593_v5  ;;  %v2393_v54 = vld [vmem:[%s5060_s7 + $0x18] sm:$0xff] }
 0x20f   :  { %2400 = vperm.xlu0 %3249, %v2390_v14   ;;  %v1955_v59 = vsel %vm1905_vm10, %v3535_v13, 0.0  ;;  %v444_v14 = vsel %vm437_vm4, 0.0, %v3489_v56  ;;  %v3500_v5 = vunpack.i.h.bf16 %v4352_v52 }
 0x210   :  { %3827 = vrot.lane.b32.xlu1 %v3826_v32, %s3872_s27  ;;  %v532_v40 = vsel %vm394_vm8, %v442_v62, %v3589_v35  ;;  %v533_v45 = vsel %vm394_vm8, %v443_v1, %v3590_v3  ;;  %v1566_v36 = vsel %vm394_vm8, %v1476_v58, %v3594_v44  ;;  %v1567_v61 = vsel %vm394_vm8, %v1477_v26, %v3595_v0  ;;  %v2395_v44 = vld [vmem:[%s5060_s7 + $0x28] sm:$0xff] }
 0x211   :  { %v3598_v33 = vpop.permute.xlu1 %3597  ;;  %v3003_v24 = vpack.c.bf16 %v533_v45, %v532_v40  ;;  %v4535_v43 = vpack.c.bf16 %v1567_v61, %v1566_v36  ;;  %v3846_v47 = vpack.i.bf16 %v1955_v59, %v1954_v29  ;;  %v445_v32 = vsel %vm437_vm4, 0.0, %v3490_v38  ;;  %v2397_v36 = vld [vmem:[%s5060_s7 + $0x38] sm:$0xff] }
 0x212   :  { %v3600_v2 = vunpack.i.h.bf16 %v3598_v33  ;;  %v3599_v28 = vunpack.i.l.bf16 %v3598_v33  ;;  %v3499_v3 = vunpack.i.l.bf16 %v4352_v52  ;;  %v961_v1 = vsel %vm951_vm1, 0.0, %v3500_v5  ;;  %v2488_v33 = vld [vmem:[%s5058_s3 + $0x38] sm:$0xff] }
 0x213   :  { %2410 = vperm.xlu0 %3249, %v2392_v31   ;;  %3004 = vmatprep.subr.bf16.mxu0 %v3003_v24  ;;  %v3565_v38 = vunpack.i.h.bf16 %v4443_v23 }
 0x214   :  { %3837 = vrot.lane.b32.xlu1 %v4059_v17, %s3876_s12  ;;  %3006 = vmatpush3.bf16.msra.mxu0 %v3003_v24  ;;  %v1048_v7 = vsel %vm394_vm8, %v958_v25, %v3599_v28  ;;  %v1049_v41 = vsel %vm394_vm8, %v959_v46, %v3600_v2  ;;  %v2396_v17 = vld [vmem:[%s5060_s7 + $0x30] sm:$0xff]  ;;  %v960_v62 = vsel %vm951_vm1, 0.0, %v3499_v3  ;;  %v2491_v28 = vld [vmem:[%s5058_s3 + $0x40] sm:$0xff]  ;;  %v3445_v3 = vunpack.i.h.bf16 %v4295_v37 }
 0x215   :  { %v3067_v51 = vpack.c.bf16 %v1049_v41, %v1048_v7  ;;  %v4564_v26 = vpop.permute.xlu1 %3602  ;;  %v3545_v7 = vunpack.i.h.bf16 %v4377_v53  ;;  %v3544_v41 = vunpack.i.l.bf16 %v4377_v53  ;;  %v3564_v53 = vunpack.i.l.bf16 %v4443_v23 }
 0x216   :  { %v3429_v23 = vunpack.i.l.bf16 %v4275_v12 }
 0x217   :  { %2420 = vperm.xlu0 %3249, %v2394_v48   ;;  %3068 = vmatprep.subr.bf16.mxu1 %v3067_v51  ;;  %v3290_v48 = vunpack.i.h.bf16 %v4184_v50 }
 0x218   :  { %3847 = vrot.lane.b32.xlu1 %v3846_v47, %s3872_s27  ;;  %3070 = vmatpush3.bf16.msra.mxu1 %v3067_v51 }
 0x21b   :  { %2430 = vperm.xlu0 %3249, %v2396_v17  }
 0x21c   :  { %2101 = vperm.xlu1 %3250, %v2093_v42   ;;  %v3340_v42 = vunpack.i.h.bf16 %v4213_v34 }
 0x21d   :  { %v3618_v8 = vpop.permute.xlu0 %3617 }
 0x21e   :  { %v3620_v49 = vunpack.i.h.bf16 %v3618_v8  ;;  %v3619_v57 = vunpack.i.l.bf16 %v3618_v8 }
 0x220   :  { %2405 = vperm.xlu1 %3250, %v2391_v9   ;;  %v534_v30 = vsel %vm394_vm8, %v444_v14, %v3619_v57  ;;  %v535_v15 = vsel %vm394_vm8, %v445_v32, %v3620_v49  ;;  %v3430_v49 = vunpack.i.h.bf16 %v4275_v12  ;;  %v3584_v14 = vunpack.i.l.bf16 %v4510_v11  ;;  %v2495_v12 = vld [vmem:[%s5058_s3 + $0x50] sm:$0xff] }
 0x221   :  { %v4566_v39 = vpop.permute.xlu0 %3627  ;;  %v3007_v58 = vpack.c.bf16 %v535_v15, %v534_v30  ;;  %v2492_v30 = vld [vmem:[%s5058_s3 + $0x48] sm:$0xff] }
 0x223   :  { %3008 = vmatprep.subr.bf16.mxu0 %v3007_v58 }
 0x224   :  { %2415 = vperm.xlu1 %3250, %v2393_v54   ;;  %3010 = vmatpush3.bf16.msra.mxu0 %v3007_v58 }
 0x225   :  { %v4573_v35 = vpop.permute.xlu0 %3637  ;;  %v3608_v0 = vpop.permute.xlu1 %3607 }
 0x226   :  { %v3610_v13 = vunpack.i.h.bf16 %v3608_v0  ;;  %v3609_v27 = vunpack.i.l.bf16 %v3608_v0  ;;  %v3444_v0 = vunpack.i.l.bf16 %v4295_v37 }
 0x228   :  { %2425 = vperm.xlu1 %3250, %v2395_v44   ;;  %v1050_v31 = vsel %vm394_vm8, %v960_v62, %v3609_v27  ;;  %v1051_v52 = vsel %vm394_vm8, %v961_v1, %v3610_v13  ;;  %v3605_v13 = vunpack.i.h.bf16 %v4564_v26  ;;  %v3604_v27 = vunpack.i.l.bf16 %v4564_v26 }
 0x229   :  { %v4582_v40 = vpop.permute.xlu0 %3647  ;;  %v4584_v45 = vpop.permute.xlu1 %3612  ;;  %v3071_v61 = vpack.c.bf16 %v1051_v52, %v1050_v31  ;;  %v1262_v52 = vsel %vm1254_vm2, %v3445_v3, 0.0  ;;  %v1261_v37 = vsel %vm1254_vm2, %v3444_v0, 0.0 }
 0x22a   :  { %v1351_v26 = vsel %vm394_vm8, %v1261_v37, %v3604_v27 }
 0x22b   :  { %3072 = vmatprep.subr.bf16.mxu1 %v3071_v61 }
 0x22c   :  { %2435 = vperm.xlu1 %3250, %v2397_v36   ;;  %3074 = vmatpush3.bf16.msra.mxu1 %v3071_v61 }
 0x22d   :  { %v4592_v24 = vpop.permute.xlu0 %3657  ;;  %v4594_v2 = vpop.permute.xlu1 %3622  ;;  %3076 = vmatprep.subr.bf16.mxu1 %v4069_v18 }
 0x22f   :  { %2806 = vmatmul.mubr.msk.f32.vlgmr.msra.gmra.mrb[0].mxu1 %vm541_vm6, %v2488_v33  ;;  %v1352_v33 = vsel %vm394_vm8, %v1262_v52, %v3605_v13 }
 0x230   :  { %3078 = vmatpush3.bf16.msra.mxu1 %v4069_v18  ;;  %2828 = vmatprep.mubr.msk.f32.mxu1 %vm541_vm6, %v2491_v28  ;;  %v3289_v18 = vunpack.i.l.bf16 %v4184_v50  ;;  %v3339_v50 = vunpack.i.l.bf16 %v4213_v34  ;;  %v1258_v34 = vsel %vm1254_vm2, %v3340_v42, 0.0  ;;  %v3525_v28 = vunpack.i.h.bf16 %v4389_v60 }
 0x231   :  { %v4603_v46 = vpop.permute.xlu0 %3667  ;;  %v4605_v25 = vpop.permute.xlu1 %3632  ;;  %3080 = vmatprep.subr.bf16.mxu1 %v4071_v19  ;;  %v1348_v58 = vsel %vm394_vm8, %v1258_v34, %v3565_v38  ;;  %v3107_v42 = vpack.c.bf16 %v1352_v33, %v1351_v26 }
 0x232   :  { %v1255_v17 = vsel %vm1254_vm2, %v3289_v18, 0.0  ;;  %v1257_v57 = vsel %vm1254_vm2, %v3339_v50, 0.0  ;;  %v1264_v50 = vsel %vm1254_vm2, %v3525_v28, 0.0 }
 0x233   :  { %v1347_v15 = vsel %vm394_vm8, %v1257_v57, %v3564_v53  ;;  %v3630_v53 = vunpack.i.h.bf16 %v4566_v39  ;;  %v3615_v57 = vunpack.i.h.bf16 %v4584_v45 }
 0x234   :  { %3082 = vmatpush3.bf16.msra.mxu1 %v4071_v19  ;;  %v1256_v19 = vsel %vm1254_vm2, %v3290_v48, 0.0  ;;  %v3099_v44 = vpack.c.bf16 %v1348_v58, %v1347_v15  ;;  %v3524_v48 = vunpack.i.l.bf16 %v4389_v60  ;;  %v3629_v60 = vunpack.i.l.bf16 %v4566_v39 }
 0x235   :  { %v4609_v59 = vpop.permute.xlu0 %3677  ;;  %v4611_v29 = vpop.permute.xlu1 %3642  ;;  %3084 = vmatprep.subr.bf16.mxu1 %v4073_v20  ;;  %v1346_v56 = vsel %vm394_vm8, %v1256_v19, %v3545_v7  ;;  %v3640_v7 = vunpack.i.h.bf16 %v4573_v35  ;;  %v3650_v19 = vunpack.i.h.bf16 %v4582_v40  ;;  %v3660_v39 = vunpack.i.h.bf16 %v4592_v24 }
 0x236   :  { %v1263_v38 = vsel %vm1254_vm2, %v3524_v48, 0.0  ;;  %v3625_v58 = vunpack.i.h.bf16 %v4594_v2  ;;  %v447_v0 = vsel %vm437_vm4, 0.0, %v3630_v53  ;;  %v446_v27 = vsel %vm437_vm4, 0.0, %v3629_v60 }
 0x237   :  { %v307_v52 = vsel %vm303_vm5, 0.0, %v3660_v39  ;;  %v3645_v53 = vunpack.i.h.bf16 %v4611_v29 }
 0x238   :  { %3086 = vmatpush3.bf16.msra.mxu1 %v4073_v20  ;;  %v1345_v20 = vsel %vm394_vm8, %v1255_v17, %v3544_v41  ;;  %v3639_v41 = vunpack.i.l.bf16 %v4573_v35  ;;  %v3649_v17 = vunpack.i.l.bf16 %v4582_v40  ;;  %v305_v35 = vsel %vm303_vm5, 0.0, %v3640_v7 }
 0x239   :  { %v4619_v51 = vpop.permute.xlu0 %3687  ;;  %v4621_v47 = vpop.permute.xlu1 %3652  ;;  %3088 = vmatprep.subr.bf16.mxu1 %v4075_v21  ;;  %v3095_v32 = vpack.c.bf16 %v1346_v56, %v1345_v20 }
 0x23a   :  { %v3690_v60 = vunpack.i.h.bf16 %v4619_v51 }
 0x23c   :  { %3090 = vmatpush3.bf16.msra.mxu1 %v4075_v21  ;;  %v3585_v21 = vunpack.i.h.bf16 %v4510_v11  ;;  %v1260_v11 = vsel %vm1254_vm2, %v3430_v49, 0.0  ;;  %v304_v49 = vsel %vm303_vm5, 0.0, %v3639_v41 }
 0x23d   :  { %v4633_v8 = vpop.permute.xlu0 %3697  ;;  %v4635_v9 = vpop.permute.xlu1 %3662  ;;  %3092 = vmatprep.subr.bf16.mxu1 %v4081_v22 }
 0x23e   :  { %v1350_v62 = vsel %vm394_vm8, %v1260_v11, %v3585_v21  ;;  %v396_v21 = vsel %vm394_vm8, %v305_v35, %v3650_v19  ;;  %v3669_v11 = vunpack.i.l.bf16 %v4603_v46  ;;  %v3654_v35 = vunpack.i.l.bf16 %v4621_v47 }
 0x240   :  { %3094 = vmatpush3.bf16.msra.mxu1 %v4081_v22  ;;  %v1259_v22 = vsel %vm1254_vm2, %v3429_v23, 0.0  ;;  %v3614_v23 = vunpack.i.l.bf16 %v4584_v45 }
 0x241   :  { %v4650_v54 = vpop.permute.xlu0 %3712  ;;  %v4652_v5 = vpop.permute.xlu1 %3672  ;;  %3096 = vmatprep.subr.bf16.mxu1 %v3095_v32  ;;  %v1349_v1 = vsel %vm394_vm8, %v1259_v22, %v3584_v14  ;;  %v3659_v14 = vunpack.i.l.bf16 %v4592_v24 }
 0x242   :  { %v3103_v61 = vpack.c.bf16 %v1350_v62, %v1349_v1  ;;  %v1479_v1 = vsel %vm1471_vm3, %v3615_v57, 0.0  ;;  %v1478_v62 = vsel %vm1471_vm3, %v3614_v23, 0.0  ;;  %v3634_v57 = vunpack.i.l.bf16 %v4605_v25 }
 0x243   :  { %2829 = vmatmul.mubr.msk.f32.vlgmr.msra.gmra.mrb[0].mxu1 %vm541_vm6, %v2492_v30  ;;  %v306_v37 = vsel %vm303_vm5, 0.0, %v3659_v14  ;;  %v1569_v19 = vsel %vm394_vm8, %v1479_v1, %v3625_v58  ;;  %v3700_v23 = vunpack.i.h.bf16 %v4633_v8 }
 0x244   :  { %3098 = vmatpush3.bf16.msra.mxu1 %v3095_v32  ;;  %2851 = vmatprep.mubr.msk.f32.mxu1 %vm541_vm6, %v2495_v12  ;;  %v395_v32 = vsel %vm394_vm8, %v304_v49, %v3649_v17  ;;  %v3624_v12 = vunpack.i.l.bf16 %v4594_v2  ;;  %v397_v7 = vsel %vm394_vm8, %v306_v37, %v3669_v11  ;;  %v3680_v17 = vunpack.i.h.bf16 %v4609_v59  ;;  %v2499_v49 = vld [vmem:[%s5058_s3 + $0x60] sm:$0xff] }
 0x245   :  { %v4667_v31 = vpop.permute.xlu1 %3682  ;;  %3100 = vmatprep.subr.bf16.mxu1 %v3099_v44  ;;  %v4671_v36 = vpop.permute.xlu0 %3722  ;;  %v3015_v2 = vpack.c.bf16 %v396_v21, %v395_v32  ;;  %v3714_v32 = vunpack.i.l.bf16 %v4650_v54  ;;  %v405_v11 = vld [vmem:[%s5058_s3] sm:$0xff]  ;;  %v1480_v37 = vsel %vm1471_vm3, %v3634_v57, 0.0 }
 0x246   :  { %v1568_v41 = vsel %vm394_vm8, %v1478_v62, %v3624_v12  ;;  %v309_v39 = vsel %vm303_vm5, 0.0, %v3680_v17  ;;  %v3725_v62 = vunpack.i.h.bf16 %v4671_v36 }
 0x247   :  { %v400_v58 = vsel %vm394_vm8, %v309_v39, %v3690_v60 }
 0x248   :  { %3102 = vmatpush3.bf16.msra.mxu1 %v3099_v44  ;;  %v3670_v44 = vunpack.i.h.bf16 %v4603_v46  ;;  %v2496_v46 = vld [vmem:[%s5058_s3 + $0x58] sm:$0xff] }
 0x249   :  { %v4677_v18 = vpop.permute.xlu1 %3692  ;;  %3104 = vmatprep.subr.bf16.mxu1 %v3103_v61  ;;  %v4687_v20 = vpop.permute.xlu0 %3732 }
 0x24c   :  { %3106 = vmatpush3.bf16.msra.mxu1 %v3103_v61 }
 0x24d   :  { %v3703_v56 = vpop.permute.xlu1 %3702  ;;  %3108 = vmatprep.subr.bf16.mxu1 %v3107_v42 }
 0x24e   :  { %v3705_v34 = vunpack.i.h.bf16 %v3703_v56  ;;  %v3704_v40 = vunpack.i.l.bf16 %v3703_v56  ;;  %v3689_v56 = vunpack.i.l.bf16 %v4619_v51  ;;  %v4743_v51 = vpack.c.bf16 %v1569_v19, %v1568_v41 }
 0x24f   :  { %v3694_v19 = vunpack.i.l.bf16 %v4677_v18 }
 0x250   :  { %3110 = vmatpush3.bf16.msra.mxu1 %v3107_v42  ;;  %v1353_v30 = vsel %vm394_vm8, %v1263_v38, %v3704_v40  ;;  %v1354_v15 = vsel %vm394_vm8, %v1264_v50, %v3705_v34  ;;  %v3679_v42 = vunpack.i.l.bf16 %v4609_v59  ;;  %v3644_v50 = vunpack.i.l.bf16 %v4611_v29  ;;  %v2478_v29 = vld [vmem:[%s5058_s3 + $0x18] sm:$0xff] }
 0x251   :  { %v3743_v45 = vpop.permute.xlu0 %3742  ;;  %v4702_v22 = vpop.permute.xlu1 %3707  ;;  %v3111_v3 = vpack.c.bf16 %v1354_v15, %v1353_v30  ;;  %v398_v38 = vsel %vm394_vm8, %v307_v52, %v3670_v44  ;;  %v3635_v59 = vunpack.i.h.bf16 %v4605_v25  ;;  %v3655_v34 = vunpack.i.h.bf16 %v4621_v47 }
 0x252   :  { %v3745_v24 = vunpack.i.h.bf16 %v3743_v45  ;;  %v3744_v13 = vunpack.i.l.bf16 %v3743_v45  ;;  %v3699_v40 = vunpack.i.l.bf16 %v4633_v8  ;;  %v308_v14 = vsel %vm303_vm5, 0.0, %v3679_v42 }
 0x253   :  { %3112 = vmatprep.subr.bf16.mxu1 %v3111_v3  ;;  %v1689_v30 = vsel %vm1688_vm7, %v3644_v50, 0.0  ;;  %v3715_v25 = vunpack.i.h.bf16 %v4650_v54  ;;  %v1690_v8 = vsel %vm1688_vm7, %v3645_v53, 0.0  ;;  %v399_v15 = vsel %vm394_vm8, %v308_v14, %v3689_v56 }
 0x254   :  { %3114 = vmatpush3.bf16.msra.mxu1 %v3111_v3  ;;  %v536_v61 = vsel %vm394_vm8, %v446_v27, %v3744_v13  ;;  %v537_v26 = vsel %vm394_vm8, %v447_v0, %v3745_v24  ;;  %v1779_v12 = vsel %vm394_vm8, %v1689_v30, %v3654_v35  ;;  %v310_v45 = vsel %vm303_vm5, 0.0, %v3699_v40 }
 0x255   :  { %v4716_v33 = vpop.permute.xlu0 %3747  ;;  %v4718_v28 = vpop.permute.xlu1 %3717  ;;  %3116 = vmatprep.subr.bf16.mxu1 %v4403_v63  ;;  %v3011_v48 = vpack.c.bf16 %v537_v26, %v536_v61  ;;  %v3665_v54 = vunpack.i.h.bf16 %v4635_v9  ;;  %v3664_v3 = vunpack.i.l.bf16 %v4635_v9  ;;  %v1780_v0 = vsel %vm394_vm8, %v1690_v8, %v3655_v34 }
 0x256   :  { %v311_v44 = vsel %vm303_vm5, 0.0, %v3700_v23  ;;  %v3675_v24 = vunpack.i.h.bf16 %v4652_v5  ;;  %v3674_v13 = vunpack.i.l.bf16 %v4652_v5  ;;  %v401_v9 = vsel %vm394_vm8, %v310_v45, %v3714_v32 }
 0x257   :  { %3012 = vmatprep.subr.bf16.mxu0 %v3011_v48  ;;  %2852 = vmatmul.mubr.msk.f32.vlgmr.msra.gmra.mrb[0].mxu1 %vm541_vm6, %v2496_v46  ;;  %v402_v52 = vsel %vm394_vm8, %v311_v44, %v3715_v25  ;;  %v1481_v5 = vsel %vm1471_vm3, %v3635_v59, 0.0  ;;  %v3023_v61 = vpack.c.bf16 %v400_v58, %v399_v15  ;;  %v4787_v26 = vpack.c.bf16 %v1780_v0, %v1779_v12 }
 0x258   :  { %3014 = vmatpush3.bf16.msra.mxu0 %v3011_v48  ;;  %3118 = vmatpush3.bf16.msra.mxu1 %v4403_v63  ;;  %v3019_v63 = vpack.c.bf16 %v398_v38, %v397_v7  ;;  %v1691_v46 = vsel %vm1688_vm7, %v3664_v3, 0.0  ;;  %v3684_v48 = vunpack.i.l.bf16 %v4667_v31  ;;  %v3735_v7 = vunpack.i.h.bf16 %v4687_v20 }
 0x259   :  { %v4748_v21 = vpop.permute.xlu0 %3762  ;;  %3016 = vmatprep.subr.bf16.mxu0 %v3015_v2  ;;  %v4750_v47 = vpop.permute.xlu1 %3727  ;;  %3120 = vmatprep.subr.bf16.mxu1 %v4464_v55  ;;  %v1692_v41 = vsel %vm1688_vm7, %v3665_v54, 0.0  ;;  %v3027_v42 = vpack.c.bf16 %v402_v52, %v401_v9  ;;  %v1781_v50 = vsel %vm394_vm8, %v1691_v46, %v3674_v13  ;;  %v3750_v60 = vunpack.i.h.bf16 %v4716_v33 }
 0x25a   :  { %2874 = vmatprep.mubr.msk.f32.mxu1 %vm541_vm6, %v2499_v49  ;;  %v3749_v56 = vunpack.i.l.bf16 %v4716_v33  ;;  %v1693_v59 = vsel %vm1688_vm7, %v3684_v48, 0.0  ;;  %v736_v34 = vsel %vm734_vm9, 0.0, %v3735_v7  ;;  %v3765_v57 = vunpack.i.h.bf16 %v4748_v21  ;;  %v406_v48 = vld [vmem:[%s5058_s3 + $0x8] sm:$0xff] }
 0x25b   :  { %2737 = vmatmul.mubr.msk.f32.vlgmr.msra.gmra.mrb[10].mxu0 %vm541_vm6, %v2478_v29  ;;  %v3695_v29 = vunpack.i.h.bf16 %v4677_v18  ;;  %v3764_v39 = vunpack.i.l.bf16 %v4748_v21  ;;  %v826_v58 = vsel %vm394_vm8, %v736_v34, %v3750_v60  ;;  %v3710_v45 = vunpack.i.h.bf16 %v4702_v22 }
 0x25c   :  { %3018 = vmatpush3.bf16.msra.mxu0 %v3015_v2  ;;  %3122 = vmatpush3.bf16.msra.mxu1 %v4464_v55  ;;  %v3724_v55 = vunpack.i.l.bf16 %v4671_v36  ;;  %v3685_v2 = vunpack.i.h.bf16 %v4667_v31  ;;  %v3734_v36 = vunpack.i.l.bf16 %v4687_v20  ;;  %v313_v31 = vsel %vm303_vm5, 0.0, %v3725_v62 }
 0x25d   :  { %v4774_v27 = vpop.permute.xlu0 %3772  ;;  %3020 = vmatprep.subr.bf16.mxu0 %v3019_v63  ;;  %v4776_v1 = vpop.permute.xlu1 %3737  ;;  %3124 = vmatprep.subr.bf16.mxu1 %v4535_v43  ;;  %v3709_v54 = vunpack.i.l.bf16 %v4702_v22  ;;  %v3720_v3 = vunpack.i.h.bf16 %v4718_v28  ;;  %v3719_v13 = vunpack.i.l.bf16 %v4718_v28  ;;  %v737_v9 = vsel %vm734_vm9, 0.0, %v3764_v39  ;;  %v2503_v28 = vld [vmem:[%s5058_s3 + $0x70] sm:$0xff] }
 0x25e   :  { %2759 = vmatprep.mubr.msk.f32.mxu0 %vm541_vm6, %v405_v11  ;;  %v312_v38 = vsel %vm303_vm5, 0.0, %v3724_v55  ;;  %v1694_v20 = vsel %vm1688_vm7, %v3685_v2, 0.0  ;;  %v735_v40 = vsel %vm734_vm9, 0.0, %v3734_v36  ;;  %v3775_v8 = vunpack.i.h.bf16 %v4774_v27 }
 0x25f   :  { %v825_v15 = vsel %vm394_vm8, %v735_v40, %v3749_v56  ;;  %v1784_v21 = vsel %vm394_vm8, %v1694_v20, %v3695_v29  ;;  %v1696_v7 = vsel %vm1688_vm7, %v3710_v45, 0.0  ;;  %v1695_v36 = vsel %vm1688_vm7, %v3709_v54, 0.0 }
 0x260   :  { %3022 = vmatpush3.bf16.msra.mxu0 %v3019_v63  ;;  %3126 = vmatpush3.bf16.msra.mxu1 %v4535_v43  ;;  %v1782_v43 = vsel %vm394_vm8, %v1692_v41, %v3675_v24  ;;  %v1783_v63 = vsel %vm394_vm8, %v1693_v59, %v3694_v19  ;;  %v2500_v24 = vld [vmem:[%s5058_s3 + $0x68] sm:$0xff]  ;;  %v3035_v22 = vpack.c.bf16 %v826_v58, %v825_v15  ;;  %v3740_v60 = vunpack.i.h.bf16 %v4776_v1 }
 0x261   :  { %v4796_v17 = vpop.permute.xlu0 %3782  ;;  %3024 = vmatprep.subr.bf16.mxu0 %v3023_v61  ;;  %3128 = vmatprep.subr.bf16.mxu1 %v4743_v51  ;;  %v3139_v46 = vpack.c.bf16 %v1782_v43, %v1781_v50  ;;  %v3143_v19 = vpack.c.bf16 %v1784_v21, %v1783_v63  ;;  %v3739_v56 = vunpack.i.l.bf16 %v4776_v1  ;;  %v3730_v29 = vunpack.i.h.bf16 %v4750_v47 }
 0x262   :  { %v3753_v53 = vpop.permute.xlu1 %3752  ;;  %v3785_v55 = vunpack.i.h.bf16 %v4796_v17  ;;  %v3784_v2 = vunpack.i.l.bf16 %v4796_v17  ;;  %v2483_v17 = vld [vmem:[%s5058_s3 + $0x20] sm:$0xff] }
 0x263   :  { %v3755_v35 = vunpack.i.h.bf16 %v3753_v53  ;;  %v3754_v49 = vunpack.i.l.bf16 %v3753_v53 }
 0x264   :  { %3026 = vmatpush3.bf16.msra.mxu0 %v3023_v61  ;;  %3130 = vmatpush3.bf16.msra.mxu1 %v4743_v51  ;;  %v3774_v51 = vunpack.i.l.bf16 %v4774_v27  ;;  %v738_v27 = vsel %vm734_vm9, 0.0, %v3765_v57  ;;  %v740_v20 = vsel %vm734_vm9, 0.0, %v3785_v55  ;;  %v3729_v57 = vunpack.i.l.bf16 %v4750_v47 }
 0x265   :  { %v3793_v23 = vpop.permute.xlu0 %3792  ;;  %3028 = vmatprep.subr.bf16.mxu0 %v3027_v42  ;;  %v1570_v32 = vsel %vm394_vm8, %v1480_v37, %v3754_v49  ;;  %v1571_v33 = vsel %vm394_vm8, %v1481_v5, %v3755_v35  ;;  %v828_v5 = vsel %vm394_vm8, %v738_v27, %v3775_v8 }
 0x266   :  { %v3795_v14 = vunpack.i.h.bf16 %v3793_v23  ;;  %v3794_v30 = vunpack.i.l.bf16 %v3793_v23  ;;  %v4816_v25 = vpop.permute.xlu1 %3757  ;;  %v3131_v18 = vpack.c.bf16 %v1571_v33, %v1570_v32  ;;  %v827_v52 = vsel %vm394_vm8, %v737_v9, %v3774_v51 }
 0x267   :  { %v3039_v50 = vpack.c.bf16 %v828_v5, %v827_v52  ;;  %v3760_v59 = vunpack.i.h.bf16 %v4816_v25  ;;  %v3759_v34 = vunpack.i.l.bf16 %v4816_v25  ;;  %v1906_v25 = vsel %vm1905_vm10, %v3739_v56, 0.0 }
 0x268   :  { %3132 = vmatprep.subr.bf16.mxu1 %v3131_v18  ;;  %3030 = vmatpush3.bf16.msra.mxu0 %v3027_v42  ;;  %v403_v12 = vsel %vm394_vm8, %v312_v38, %v3794_v30  ;;  %v404_v11 = vsel %vm394_vm8, %v313_v31, %v3795_v14  ;;  %v1785_v31 = vsel %vm394_vm8, %v1695_v36, %v3719_v13  ;;  %v1907_v30 = vsel %vm1905_vm10, %v3740_v60, 0.0 }
 0x269   :  { %3134 = vmatpush3.bf16.msra.mxu1 %v3131_v18  ;;  %v3798_v0 = vpop.permute.xlu0 %3797  ;;  %v3031_v44 = vpack.c.bf16 %v404_v11, %v403_v12  ;;  %v1786_v38 = vsel %vm394_vm8, %v1696_v7, %v3720_v3  ;;  %v1996_v15 = vsel %vm394_vm8, %v1906_v25, %v3759_v34  ;;  %v1997_v58 = vsel %vm394_vm8, %v1907_v30, %v3760_v59  ;;  %v2484_v59 = vld [vmem:[%s5058_s3 + $0x28] sm:$0xff] }
 0x26a   :  { %v4834_v62 = vpop.permute.xlu1 %3767  ;;  %3136 = vmatprep.subr.bf16.mxu1 %v4787_v26  ;;  %v3800_v37 = vunpack.i.h.bf16 %v3798_v0  ;;  %v3799_v61 = vunpack.i.l.bf16 %v3798_v0  ;;  %v3147_v14 = vpack.c.bf16 %v1786_v38, %v1785_v31  ;;  %v1698_v13 = vsel %vm1688_vm7, %v3730_v29, 0.0 }
 0x26b   :  { %3032 = vmatprep.subr.bf16.mxu0 %v3031_v44  ;;  %v3770_v8 = vunpack.i.h.bf16 %v4834_v62  ;;  %v3769_v12 = vunpack.i.l.bf16 %v4834_v62  ;;  %v1697_v27 = vsel %vm1688_vm7, %v3729_v57, 0.0 }
 0x26c   :  { %3034 = vmatpush3.bf16.msra.mxu0 %v3031_v44  ;;  %2875 = vmatmul.mubr.msk.f32.vlgmr.msra.gmra.mrb[0].mxu1 %vm541_vm6, %v2500_v24  ;;  %v830_v49 = vsel %vm394_vm8, %v740_v20, %v3800_v37  ;;  %v2504_v20 = vld [vmem:[%s5058_s3 + $0x78] sm:$0xff] }
 0x26d   :  { %3138 = vmatpush3.bf16.msra.mxu1 %v4787_v26  ;;  %v3813_v41 = vpop.permute.xlu0 %3812  ;;  %3036 = vmatprep.subr.bf16.mxu0 %v3035_v22  ;;  %v739_v26 = vsel %vm734_vm9, 0.0, %v3784_v2  ;;  %v1909_v9 = vsel %vm1905_vm10, %v3770_v8, 0.0  ;;  %v3155_v2 = vpack.c.bf16 %v1997_v58, %v1996_v15  ;;  %v1908_v52 = vsel %vm1905_vm10, %v3769_v12, 0.0 }
 0x26e   :  { %v4854_v42 = vpop.permute.xlu1 %3777  ;;  %3140 = vmatprep.subr.bf16.mxu1 %v3139_v46  ;;  %2897 = vmatprep.mubr.msk.f32.mxu1 %vm541_vm6, %v2503_v28  ;;  %v3815_v53 = vunpack.i.h.bf16 %v3813_v41  ;;  %v3814_v43 = vunpack.i.l.bf16 %v3813_v41  ;;  %v829_v35 = vsel %vm394_vm8, %v739_v26, %v3799_v61 }
 0x26f   :  { %2760 = vmatmul.mubr.msk.f32.vlgmr.msra.gmra.mrb[10].mxu0 %vm541_vm6, %v406_v48  ;;  %v3043_v39 = vpack.c.bf16 %v830_v49, %v829_v35  ;;  %v3780_v11 = vunpack.i.h.bf16 %v4854_v42  ;;  %v3779_v21 = vunpack.i.l.bf16 %v4854_v42 }
 0x270   :  { %3038 = vmatpush3.bf16.msra.mxu0 %v3035_v22  ;;  %2782 = vmatprep.mubr.msk.f32.mxu0 %vm541_vm6, %v2483_v17  ;;  %v742_v33 = vsel %vm734_vm9, 0.0, %v3815_v53  ;;  %v741_v63 = vsel %vm734_vm9, 0.0, %v3814_v43  ;;  %v2507_v53 = vld [vmem:[%s5058_s3 + $0x80] sm:$0xff] }
 0x271   :  { %3142 = vmatpush3.bf16.msra.mxu1 %v3139_v46  ;;  %v3823_v40 = vpop.permute.xlu0 %3822  ;;  %3040 = vmatprep.subr.bf16.mxu0 %v3039_v50  ;;  %v1998_v7 = vsel %vm394_vm8, %v1908_v52, %v3779_v21  ;;  %v1999_v36 = vsel %vm394_vm8, %v1909_v9, %v3780_v11  ;;  %v2508_v11 = vld [vmem:[%s5058_s3 + $0x88] sm:$0xff] }
 0x272   :  { %v3825_v23 = vunpack.i.h.bf16 %v3823_v40  ;;  %v3824_v1 = vunpack.i.l.bf16 %v3823_v40  ;;  %v4871_v32 = vpop.permute.xlu1 %3787  ;;  %3144 = vmatprep.subr.bf16.mxu1 %v3143_v19  ;;  %v3159_v43 = vpack.c.bf16 %v1999_v36, %v1998_v7  ;;  %v2125_v21 = vld [vmem:[%s5061_s6 + $0x8] sm:$0xff]  ;;  %v3852_v7 = vld [vmem:[%s5055_s0 + $0x18] sm:$0xff] }
 0x273   :  { %v3790_v41 = vunpack.i.h.bf16 %v4871_v32 }
 0x274   :  { %3042 = vmatpush3.bf16.msra.mxu0 %v3039_v50  ;;  %v831_v18 = vsel %vm394_vm8, %v741_v63, %v3824_v1  ;;  %v832_v47 = vsel %vm394_vm8, %v742_v33, %v3825_v23 }
 0x275   :  { %3146 = vmatpush3.bf16.msra.mxu1 %v3143_v19  ;;  %v3833_v51 = vpop.permute.xlu0 %3832  ;;  %3044 = vmatprep.subr.bf16.mxu0 %v3043_v39  ;;  %v3047_v54 = vpack.c.bf16 %v832_v47, %v831_v18  ;;  %v3789_v19 = vunpack.i.l.bf16 %v4871_v32  ;;  %v1911_v60 = vsel %vm1905_vm10, %v3790_v41, 0.0  ;;  %v3853_v41 = vld [vmem:[%s5055_s0 + $0x28] sm:$0xff] }
 0x276   :  { %v3803_v45 = vpop.permute.xlu1 %3802  ;;  %3148 = vmatprep.subr.bf16.mxu1 %v3147_v14  ;;  %v3835_v3 = vunpack.i.h.bf16 %v3833_v51  ;;  %v3834_v0 = vunpack.i.l.bf16 %v3833_v51 }
 0x277   :  { %v3805_v44 = vunpack.i.h.bf16 %v3803_v45  ;;  %v3804_v24 = vunpack.i.l.bf16 %v3803_v45  ;;  %v1910_v56 = vsel %vm1905_vm10, %v3789_v19, 0.0  ;;  %v2127_v45 = vld [vmem:[%s5061_s6 + $0x18] sm:$0xff] }
 0x278   :  { %3046 = vmatpush3.bf16.msra.mxu0 %v3043_v39  ;;  %v744_v46 = vsel %vm734_vm9, 0.0, %v3835_v3  ;;  %v743_v48 = vsel %vm734_vm9, 0.0, %v3834_v0  ;;  %v2129_v3 = vld [vmem:[%s5061_s6 + $0x28] sm:$0xff]  ;;  %v2130_v0 = vld [vmem:[%s5061_s6 + $0x30] sm:$0xff] }
 0x279   :  { %3150 = vmatpush3.bf16.msra.mxu1 %v3147_v14  ;;  %v3843_v62 = vpop.permute.xlu0 %3842  ;;  %3048 = vmatprep.subr.bf16.mxu0 %v3047_v54  ;;  %v1787_v22 = vsel %vm394_vm8, %v1697_v27, %v3804_v24  ;;  %v1788_v55 = vsel %vm394_vm8, %v1698_v13, %v3805_v44  ;;  %v2131_v44 = vld [vmem:[%s5061_s6 + $0x38] sm:$0xff]  ;;  %v2116_v24 = vld [vmem:[%s5062_s5] sm:$0xff] }
 0x27a   :  { %v3845_v5 = vunpack.i.h.bf16 %v3843_v62  ;;  %v3844_v28 = vunpack.i.l.bf16 %v3843_v62  ;;  %v3808_v37 = vpop.permute.xlu1 %3807  ;;  %v3151_v61 = vpack.c.bf16 %v1788_v55, %v1787_v22 }
 0x27b   :  { %v3810_v50 = vunpack.i.h.bf16 %v3808_v37  ;;  %v3809_v31 = vunpack.i.l.bf16 %v3808_v37 }
 0x27c   :  { %3152 = vmatprep.subr.bf16.mxu1 %v3151_v61  ;;  %3050 = vmatpush3.bf16.msra.mxu0 %v3047_v54  ;;  %v833_v17 = vsel %vm394_vm8, %v743_v48, %v3844_v28  ;;  %v834_v42 = vsel %vm394_vm8, %v744_v46, %v3845_v5  ;;  %v2128_v54 = vld [vmem:[%s5061_s6 + $0x20] sm:$0xff]  ;;  %v3851_v46 = vld [vmem:[%s5055_s0 + $0x8] sm:$0xff] }
 0x27d   :  { %3154 = vmatpush3.bf16.msra.mxu1 %v3151_v61  ;;  %v3051_v38 = vpack.c.bf16 %v834_v42, %v833_v17  ;;  %v2000_v34 = vsel %vm394_vm8, %v1910_v56, %v3809_v31  ;;  %v2001_v40 = vsel %vm394_vm8, %v1911_v60, %v3810_v50  ;;  %v3854_v17 = vld [vmem:[%s5055_s0 + $0x38] sm:$0xff]  ;;  %v3855_v50 = vld [vmem:[%s5055_s0] sm:$0xff] }
 0x27e   :  { %v3818_v26 = vpop.permute.xlu1 %3817  ;;  %3156 = vmatprep.subr.bf16.mxu1 %v3155_v2  ;;  %v3163_v33 = vpack.c.bf16 %v2001_v40, %v2000_v34  ;;  %v2117_v34 = vld [vmem:[%s5062_s5 + $0x8] sm:$0xff]  ;;  %v2118_v40 = vld [vmem:[%s5062_s5 + $0x10] sm:$0xff] }
 0x27f   :  { %3052 = vmatprep.subr.bf16.mxu0 %v3051_v38  ;;  %v3820_v35 = vunpack.i.h.bf16 %v3818_v26  ;;  %v3819_v49 = vunpack.i.l.bf16 %v3818_v26  ;;  %v3857_v26 = vld [vmem:[%s5055_s0 + $0x20] sm:$0xff] }
 0x280   :  { %3054 = vmatpush3.bf16.msra.mxu0 %v3051_v38  ;;  %2898 = vmatmul.mubr.msk.f32.vlgmr.msra.gmra.mrb[0].mxu1 %vm541_vm6, %v2504_v20  ;;  %v3856_v38 = vld [vmem:[%s5055_s0 + $0x10] sm:$0xff] }
 0x281   :  { %3158 = vmatpush3.bf16.msra.mxu1 %v3155_v2  ;;  %2920 = vmatprep.mubr.msk.f32.mxu1 %vm541_vm6, %v2507_v53  ;;  %v1913_v1 = vsel %vm1905_vm10, %v3820_v35, 0.0  ;;  %v1912_v32 = vsel %vm1905_vm10, %v3819_v49, 0.0 }
 0x282   :  { %v3828_v29 = vpop.permute.xlu1 %3827  ;;  %3160 = vmatprep.subr.bf16.mxu1 %v3159_v43  ;;  %3176 = vmatprep.subr.bf16.mxu0 %v3931_v4 }
 0x283   :  { %v3830_v57 = vunpack.i.h.bf16 %v3828_v29  ;;  %v3829_v23 = vunpack.i.l.bf16 %v3828_v29  ;;  %2783 = vmatmul.mubr.msk.f32.vlgmr.msra.gmra.mrb[10].mxu0 %vm541_vm6, %v2484_v59  ;;  %v2119_v29 = vld [vmem:[%s5062_s5 + $0x18] sm:$0xff] }
 0x284   :  { %3178 = vmatpush3.bf16.msra.mxu0 %v3931_v4 }
 0x285   :  { %3162 = vmatpush3.bf16.msra.mxu1 %v3159_v43  ;;  %v2002_v63 = vsel %vm394_vm8, %v1912_v32, %v3829_v23  ;;  %v2003_v39 = vsel %vm394_vm8, %v1913_v1, %v3830_v57  ;;  %3180 = vmatprep.subr.bf16.mxu0 %v3936_v6  ;;  %v3858_v43 = vld [vmem:[%s5055_s0 + $0x30] sm:$0xff]  ;;  %v2120_v57 = vld [vmem:[%s5062_s5 + $0x20] sm:$0xff]  ;;  %v2121_v23 = vld [vmem:[%s5062_s5 + $0x28] sm:$0xff] }
 0x286   :  { %v3838_v14 = vpop.permute.xlu1 %3837  ;;  %3164 = vmatprep.subr.bf16.mxu1 %v3163_v33  ;;  %v3167_v18 = vpack.c.bf16 %v2003_v39, %v2002_v63  ;;  %v2122_v1 = vld [vmem:[%s5062_s5 + $0x30] sm:$0xff]  ;;  %v2123_v32 = vld [vmem:[%s5062_s5 + $0x38] sm:$0xff] }
 0x287   :  { %v3840_v30 = vunpack.i.h.bf16 %v3838_v14  ;;  %v3839_v25 = vunpack.i.l.bf16 %v3838_v14 }
 0x288   :  { %3182 = vmatpush3.bf16.msra.mxu0 %v3936_v6 }
 0x289   :  { %3166 = vmatpush3.bf16.msra.mxu1 %v3163_v33  ;;  %3184 = vmatprep.subr.bf16.mxu0 %v3951_v10  ;;  %v1915_v51 = vsel %vm1905_vm10, %v3840_v30, 0.0  ;;  %v1914_v15 = vsel %vm1905_vm10, %v3839_v25, 0.0 }
 0x28a   :  { %v3848_v47 = vpop.permute.xlu1 %3847  ;;  %3168 = vmatprep.subr.bf16.mxu1 %v3167_v18  ;;  %v2097_v52 = vpop.permute.xlu0 %2096 }
 0x28b   :  { %v3850_v4 = vunpack.i.h.bf16 %v3848_v47  ;;  %v3849_v8 = vunpack.i.l.bf16 %v3848_v47 }
 0x28c   :  { %3186 = vmatpush3.bf16.msra.mxu0 %v3951_v10  ;;  %v2124_v10 = vld [vmem:[%s5061_s6] sm:$0xff] }
 0x28d   :  { %3170 = vmatpush3.bf16.msra.mxu1 %v3167_v18  ;;  %v2004_v58 = vsel %vm394_vm8, %v1914_v15, %v3849_v8  ;;  %v2005_v12 = vsel %vm394_vm8, %v1915_v51, %v3850_v4  ;;  %3188 = vmatprep.subr.bf16.mxu0 %v3970_v16 }
 0x28e   :  { %v3171_v6 = vpack.c.bf16 %v2005_v12, %v2004_v58  ;;  %2939 = vmatprep.mubr.msk.f32.mxu0 %vm107_vm0, %v2124_v10  ;;  %v2401_v63 = vpop.permute.xlu0 %2400 }
 0x290   :  { %3172 = vmatprep.subr.bf16.mxu1 %v3171_v6  ;;  %3190 = vmatpush3.bf16.msra.mxu0 %v3970_v16  ;;  %v2126_v16 = vld [vmem:[%s5061_s6 + $0x10] sm:$0xff] }
 0x291   :  { %3174 = vmatpush3.bf16.msra.mxu1 %v3171_v6 }
 0x292   :  { %v2411_v30 = vpop.permute.xlu0 %2410 }
 0x293   :  { %2940 = vmatmul.mubr.msk.f32.vlgmr.msra.gmra.mrb[12].mxu0 %vm107_vm0, %v2125_v21 }
 0x294   :  { %2921 = vmatmul.mubr.msk.f32.vlgmr.msra.gmra.mrb[0].mxu1 %vm541_vm6, %v2508_v11  ;;  %2942 = vmatprep.mubr.msk.f32.mxu0 %vm107_vm0, %v2126_v16 }
 0x296   :  { %v2421_v11 = vpop.permute.xlu0 %2420 }
 0x297   :  { %2943 = vmatmul.mubr.msk.f32.gmra.mrb[14].mxu0 %vm107_vm0, %v2127_v45 }
 0x298   :  { %2945 = vmatprep.mubr.msk.f32.mxu0 %vm107_vm0, %v2128_v54 }
 0x29b   :  { %2946 = vmatmul.mubr.msk.f32.gmra.mrb[16].mxu0 %vm107_vm0, %v2129_v3  ;;  %v2102_v55 = vpop.permute.xlu1 %2101 }
 0x29c   :  { %2948 = vmatprep.mubr.msk.f32.mxu0 %vm107_vm0, %v2130_v0 }
 0x29f   :  { %2949 = vmatmul.mubr.msk.f32.gmra.mrb[18].mxu0 %vm107_vm0, %v2131_v44  ;;  %v2406_v33 = vpop.permute.xlu1 %2405 }
 0x2a0   :  { %2967 = vmatprep.mubr.msk.f32.mxu0 %vm107_vm0, %v2116_v24 }
 0x2a3   :  { %v2416_v39 = vpop.permute.xlu1 %2415 }
 0x2a7   :  { %v2426_v12 = vpop.permute.xlu1 %2425 }
 0x2ab   :  { %v2436_v44 = vpop.permute.xlu1 %2435 }
 0x356   :  { %v2784_v13 = vpop.f32.mrb[10].mxu0 }
 0x357   :  { %v910_v27 = vpop.f32.mrb[11].mxu0 }
 0x367   :  { %v2922_v9 = vpop.f32.mrb[0].mxu1 }
 0x368   :  { %v3207_v62 = vadd.f32 %v2922_v9, %v2784_v13  ;;  %v2081_v22 = vpop.f32.mrb[1].mxu1 }
 0x369   :  { %v3208_v2 = vadd.f32 %v2081_v22, %v910_v27  ;;  %v2431_v27 = vpop.permute.xlu0 %2430 }
 0x36a   :  { %v2105_v5 = vadd.f32 %v3207_v62, %v2102_v55 }
 0x36b   :  { %v2104_v28 = vadd.f32 %v3208_v2, %v2097_v52 }
 0x36c   :  { %v2107_v37 = vmax.f32 %v2105_v5, 0.0 }
 0x36d   :  { %v2106_v61 = vmax.f32 %v2104_v28, 0.0 }
 0x36e   :  { %v2109_v48 = vmul.f32 %v3851_v46, %v2107_v37  ;;  %v2111_v36 = vmul.f32 %v3852_v7, %v2107_v37  ;;  %v2113_v19 = vmul.f32 %v3853_v41, %v2107_v37  ;;  %v2115_v42 = vmul.f32 %v3854_v17, %v2107_v37 }
 0x36f   :  { %v2108_v31 = vmul.f32 %v3855_v50, %v2106_v61  ;;  %v2110_v20 = vmul.f32 %v3856_v38, %v2106_v61  ;;  %v2112_v53 = vmul.f32 %v3857_v26, %v2106_v61  ;;  %v2114_v60 = vmul.f32 %v3858_v43, %v2106_v61 }
 0x371   :  { %v3191_v56 = vpack.c.bf16 %v2109_v48, %v2108_v31  ;;  %v3195_v35 = vpack.c.bf16 %v2111_v36, %v2110_v20  ;;  %v3199_v49 = vpack.c.bf16 %v2113_v19, %v2112_v53  ;;  %v3203_v59 = vpack.c.bf16 %v2115_v42, %v2114_v60 }
 0x373   :  { %3192 = vmatprep.subr.bf16.mxu0 %v3191_v56 }
 0x374   :  { %3194 = vmatpush3.bf16.msra.mxu0 %v3191_v56 }
 0x375   :  { %3196 = vmatprep.subr.bf16.mxu0 %v3195_v35 }
 0x378   :  { %3198 = vmatpush3.bf16.msra.mxu0 %v3195_v35 }
 0x379   :  { %3200 = vmatprep.subr.bf16.mxu0 %v3199_v49 }
 0x37c   :  { %3202 = vmatpush3.bf16.msra.mxu0 %v3199_v49 }
 0x37d   :  { %3204 = vmatprep.subr.bf16.mxu0 %v3203_v59 }
 0x380   :  { %3206 = vmatpush3.bf16.msra.mxu0 %v3203_v59 }
 0x383   :  { %2968 = vmatmul.mubr.msk.f32.vlgmr.msra.gmra.mrb[12].mxu0 %vm107_vm0, %v2117_v34 }
 0x384   :  { %2970 = vmatprep.mubr.msk.f32.mxu0 %vm107_vm0, %v2118_v40 }
 0x387   :  { %2971 = vmatmul.mubr.msk.f32.gmra.mrb[14].mxu0 %vm107_vm0, %v2119_v29 }
 0x388   :  { %2973 = vmatprep.mubr.msk.f32.mxu0 %vm107_vm0, %v2120_v57 }
 0x38b   :  { %2974 = vmatmul.mubr.msk.f32.gmra.mrb[16].mxu0 %vm107_vm0, %v2121_v23 }
 0x38c   :  { %2976 = vmatprep.mubr.msk.f32.mxu0 %vm107_vm0, %v2122_v1 }
 0x38f   :  { %2977 = vmatmul.mubr.msk.f32.gmra.mrb[18].mxu0 %vm107_vm0, %v2123_v32 }
 0x456   :  { %v2969_v14 = vpop.f32.mrb[12].mxu0 }
 0x457   :  { %v2439_v25 = vadd.f32 %v2969_v14, %v2406_v33  ;;  %v2351_v18 = vpop.f32.mrb[13].mxu0 }
 0x458   :  { %v2438_v47 = vadd.f32 %v2401_v63, %v2351_v18 }
 0x459   :  { %v2447_v4 = vmax.f32 %v2439_v25, 0.0 }
 0x45a   :  { %v2446_v8 = vmax.f32 %v2438_v47, 0.0  ;;  %v2972_v51 = vpop.f32.mrb[14].mxu0 }
 0x45b   :  { %2456 = vst.msk [vmem:[%s5063_s8 + $0x8] sm:$0xff] %vm2454_vm11, %v2447_v4  ;;  %v2441_v15 = vadd.f32 %v2972_v51, %v2416_v39  ;;  %v2361_v58 = vpop.f32.mrb[15].mxu0 }
 0x45c   :  { %2455 = vst.msk [vmem:[%s5063_s8] sm:$0xff] %vm2454_vm11, %v2446_v8  ;;  %v2440_v6 = vadd.f32 %v2411_v30, %v2361_v58 }
 0x45d   :  { %v2449_v10 = vmax.f32 %v2441_v15, 0.0 }
 0x45e   :  { %v2448_v21 = vmax.f32 %v2440_v6, 0.0  ;;  %v2975_v16 = vpop.f32.mrb[16].mxu0 }
 0x45f   :  { %2458 = vst.msk [vmem:[%s5063_s8 + $0x18] sm:$0xff] %vm2454_vm11, %v2449_v10  ;;  %v2443_v45 = vadd.f32 %v2975_v16, %v2426_v12  ;;  %v2371_v54 = vpop.f32.mrb[17].mxu0 }
 0x460   :  { %2457 = vst.msk [vmem:[%s5063_s8 + $0x10] sm:$0xff] %vm2454_vm11, %v2448_v21  ;;  %v2442_v3 = vadd.f32 %v2421_v11, %v2371_v54 }
 0x461   :  { %v2451_v0 = vmax.f32 %v2443_v45, 0.0 }
 0x462   :  { %v2450_v24 = vmax.f32 %v2442_v3, 0.0  ;;  %v2978_v13 = vpop.f32.mrb[18].mxu0 }
 0x463   :  { %2460 = vst.msk [vmem:[%s5063_s8 + $0x28] sm:$0xff] %vm2454_vm11, %v2451_v0  ;;  %v2445_v9 = vadd.f32 %v2978_v13, %v2436_v44  ;;  %v2381_v62 = vpop.f32.mrb[19].mxu0 }
 0x464   :  { %2459 = vst.msk [vmem:[%s5063_s8 + $0x20] sm:$0xff] %vm2454_vm11, %v2450_v24  ;;  %v2444_v22 = vadd.f32 %v2431_v27, %v2381_v62 }
 0x465   :  { %v2453_v55 = vmax.f32 %v2445_v9, 0.0 }
 0x466   :  { %v2452_v2 = vmax.f32 %v2444_v22, 0.0 }
 0x467   :  { %2462 = vst.msk [vmem:[%s5063_s8 + $0x38] sm:$0xff] %vm2454_vm11, %v2453_v55 }
 0x468   :  { %2461 = vst.msk [vmem:[%s5063_s8 + $0x30] sm:$0xff] %vm2454_vm11, %v2452_v2 }

</bundles_post_ra>
